<compile_context>
chip_gen: v7x
topology: tpu7x:2x2x1
jax: 0.10.0
libtpu: 0.0.40
codegen_flags: <defaults>
</compile_context>

<pallas_src>
import functools

import jax
import jax.numpy as jnp
from jax.experimental import pallas as pl
from jax.experimental.pallas import tpu as pltpu


def _lascc_fused_kernel(feat_ref, win_ref, o_ref, *, topk):
    """One batch per grid step:
    normalize -> batched bf16 correlation matmul -> per channel: zero-window*alpha ->
    softmax(-1)*softmax(-2) (single exp map) -> top-k over the patch axis, written
    lane-dense / sublane-padded as (3, 8, N)."""
    # ---------- shared per-batch work (channels hoisted out of the grid) ----------
    f = feat_ref[0]                                    # (2, N, C) f32
    ss = jnp.sum(f * f, axis=-1, keepdims=True)        # (2, N, 1)
    # sqrt(max(ss, eps^2)) == max(||v||, eps): same clamp as torch F.normalize (eps=1e-12).
    fn = f * jax.lax.rsqrt(jnp.maximum(ss, 1e-24))
    fb = fn.astype(jnp.bfloat16)

    # Both correlation maps in ONE batched MXU call (bf16 inputs, f32 accumulation).
    corr = jnp.einsum("pnc,pmc->pnm", fb, fb,
                      preferred_element_type=jnp.float32)   # (2, N, N)
    c0 = corr[0]
    c1 = corr[1]

    win = win_ref[...]                                  # (N, N); alpha already folded in

    # Zero the sublane-padding rows once (rows topk..7 of each channel block).
    o_ref[...] = jnp.zeros_like(o_ref)

    # ---------- per-channel: window -> double softmax -> top-k ----------
    for ch in range(3):                                 # static 3-iteration loop
        if ch == 0:
            c = c0
        elif ch == 1:
            c = c1
        else:
            c = (c0 + c1) * 0.5                         # channel average
        z = c * win                                     # (N, N), symmetric

        # softmax(dim=-1) * softmax(dim=-2) with a SINGLE exp map: softmax is
        # shift-invariant, so one global max replaces per-row and per-col maxes.
        # |z| <= |alpha| (unit-norm features, window in [0,1]) => no underflow.
        gmax = jnp.max(jnp.max(z, axis=-1, keepdims=True), axis=-2, keepdims=True)  # (1,1)
        e = jnp.exp(z - gmax)                           # (N, N)  one EUP exp map
        inv_r = 1.0 / jnp.sum(e, axis=-1, keepdims=True)     # (N, 1) exact
        inv_c = 1.0 / jnp.sum(e, axis=-2, keepdims=True)     # (1, N) exact
        y = (e * inv_r) * (e * inv_c)                   # (N, N), symmetric up to ulps

        # Top-k over the "other patch" axis.  y is symmetric, so the per-row top-k
        # equals the per-column top-k; reducing over sublanes (axis 0) yields
        # lane-dense (1, N) rows that store directly -- no transpose.
        v = y
        for kk in range(topk):
            m = jnp.max(v, axis=0, keepdims=True)       # (1, N)
            o_ref[0, ch, kk:kk + 1, :] = m
            if kk + 1 < topk:
                # y > 0 everywhere, so 0.0 is a safe knock-out value.
                # (Exact float ties are dropped rather than repeated like torch.topk.)
                v = jnp.where(v >= m, 0.0, v)


def lascc_forward(x, alpha, topk=3, patch_size=2):
    assert patch_size == 2, "kernel written for patch_size=2 (module default)"
    b, c, h, w = x.shape
    nph, npw = h // patch_size, w // patch_size
    n = nph * npw
    assert n * patch_size * patch_size == h * w

    x = x.astype(jnp.float32)

    # ---- glue: per-patch diagonal pixels -> (b, 2, N, c) ----
    xr = x.reshape(b, c, nph, patch_size, npw, patch_size)
    diag = jnp.stack([xr[:, :, :, p_, :, p_] for p_ in range(patch_size)], axis=1)  # (b,2,c,nph,npw)
    feat = jnp.transpose(diag, (0, 1, 3, 4, 2)).reshape(b, patch_size, n, c)

    # ---- glue: zero-window mask (data-independent) with alpha folded in ----
    s_r = nph * 0.05
    s_c = npw * 0.05
    rr = jnp.arange(nph, dtype=jnp.float32)
    cc = jnp.arange(npw, dtype=jnp.float32)
    gr = jnp.exp(-((rr[None, :] - rr[:, None]) ** 2) / (2.0 * s_r ** 2))  # (ir, jr)
    gc = jnp.exp(-((cc[None, :] - cc[:, None]) ** 2) / (2.0 * s_c ** 2))  # (ic, jc)
    win = 1.0 - jnp.einsum("ij,kl->ikjl", gr, gc).reshape(n, n)
    alpha = jnp.asarray(alpha, dtype=jnp.float32)
    win_alpha = (win * alpha).astype(jnp.float32)                         # (N, N)

    k_pad = ((topk + 7) // 8) * 8      # sublane-dense (multiple of 8) output rows

    # ---- single fused Pallas kernel, grid over batch only ----
    grid_spec = pltpu.PrefetchScalarGridSpec(
        num_scalar_prefetch=0,
        grid=(b,),
        in_specs=[
            pl.BlockSpec((1, patch_size, n, c), lambda i: (i, 0, 0, 0)),
            pl.BlockSpec((n, n), lambda i: (0, 0)),
        ],
        out_specs=pl.BlockSpec((1, 3, k_pad, n), lambda i: (i, 0, 0, 0)),
    )
    topv = pl.pallas_call(
        functools.partial(_lascc_fused_kernel, topk=topk),
        out_shape=jax.ShapeDtypeStruct((b, 3, k_pad, n), jnp.float32),
        grid_spec=grid_spec,
        compiler_params=pltpu.CompilerParams(
            dimension_semantics=("parallel",),
            vmem_limit_bytes=48 * 1024 * 1024,
        ),
    )(feat, win_alpha)
    topv = topv[:, :, :topk, :]                                  # drop sublane padding

    # ---- glue: de-patchify back to (b, topk, h, w) ----
    # torch new_x channels by patch-area index pa = pr*2 + pc: [corr0, avg, avg, corr1]
    ch_idx = jnp.array([[0, 2], [2, 1]], dtype=jnp.int32)        # [pr][pc] -> corr channel
    g = topv[:, ch_idx]                                          # (b, pr, pc, k, N)
    g = g.reshape(b, patch_size, patch_size, topk, nph, npw)     # (b, pr, pc, k, ir, ic)
    out = jnp.transpose(g, (0, 3, 4, 1, 5, 2)).reshape(b, topk, h, w)
    return out


if __name__ == "__main__":
    key = jax.random.PRNGKey(0)
    b, c, h, w = 2, 32, 16, 16          # small shapes; conv layers are unused by forward()
    x = jax.random.normal(key, (b, c, h, w), dtype=jnp.float32)

    alpha = jnp.float32(5.0)            # nn.Parameter(torch.tensor(5.0)) -- deterministic init

    out = lascc_forward(x, alpha, topk=3, patch_size=2)
    out = jax.block_until_ready(out)

    expected_shape = (b, 3, h, w)
    assert out.shape == expected_shape, (out.shape, expected_shape)
    assert bool(jnp.all(jnp.isfinite(out)))
    print("KERNEL_OK")
</pallas_src>

<mosaic_0001>
module attributes {stable_mosaic.version = 11 : i64} {
  func.func @_lascc_fused_kernel(%arg0: i32, %arg1: memref<1x2x64x32xf32, #tpu.memory_space<vmem>>, %arg2: memref<64x64xf32, #tpu.memory_space<vmem>>, %arg3: memref<1x3x8x64xf32, #tpu.memory_space<vmem>>) attributes {dimension_semantics = [#tpu.dimension_semantics<parallel>], iteration_bounds = array<i64: 2>, scalar_prefetch = 0 : i64, scratch_operands = 0 : i64, tpu.core_type = #tpu.core_type<tc>, window_params = [{transform_indices = @transform_0, window_bounds = array<i64: 1, 2, 64, 32>}, {pipeline_mode = #tpu.pipeline_mode<synchronous>, transform_indices = @transform_1, window_bounds = array<i64: 64, 64>}, {transform_indices = @transform_2, window_bounds = array<i64: 1, 3, 8, 64>}]} {
    %c0 = arith.constant 0 : index
    %c0_0 = arith.constant 0 : index
    %c0_1 = arith.constant 0 : index
    %c0_2 = arith.constant 0 : index
    %0 = vector.load %arg1[%c0, %c0_0, %c0_1, %c0_2] : memref<1x2x64x32xf32, #tpu.memory_space<vmem>>, vector<1x2x64x32xf32>
    %1 = vector.shape_cast %0 : vector<1x2x64x32xf32> to vector<2x64x32xf32>
    %2 = arith.mulf %1, %1 : vector<2x64x32xf32>
    %cst = arith.constant dense<0.000000e+00> : vector<2x64xf32>
    %3 = vector.multi_reduction <add>, %2, %cst [2] : vector<2x64x32xf32> to vector<2x64xf32>
    %4 = vector.shape_cast %3 : vector<2x64xf32> to vector<2x64x1xf32>
    %cst_3 = arith.constant 1.000000e-24 : f32
    %5 = vector.broadcast %cst_3 : f32 to vector<2x64x1xf32>
    %6 = arith.maximumf %4, %5 : vector<2x64x1xf32>
    %7 = math.rsqrt %6 : vector<2x64x1xf32>
    %8 = vector.broadcast %7 : vector<2x64x1xf32> to vector<2x64x32xf32>
    %9 = arith.mulf %1, %8 : vector<2x64x32xf32>
    %10 = arith.truncf %9 : vector<2x64x32xf32> to vector<2x64x32xbf16>
    "tpu.trace_start"() <{level = 10 : i32, message = "pnc,pmc->pnm"}> : () -> ()
    %cst_4 = arith.constant dense<0.000000e+00> : vector<2x64x64xf32>
    %11 = tpu.matmul %10, %10, %cst_4 {dimension_numbers = #tpu.dot_dimension_numbers<[2], [2], [1], [1], [0, 0, 0, 1, 1, 1], [0], [0]>} : vector<2x64x32xbf16>, vector<2x64x32xbf16>, vector<2x64x64xf32> -> vector<2x64x64xf32>
    "tpu.trace_stop"() : () -> ()
    %12 = vector.extract_strided_slice %11 {offsets = [0, 0, 0], sizes = [1, 64, 64], strides = [1, 1, 1]} : vector<2x64x64xf32> to vector<1x64x64xf32>
    %13 = vector.shape_cast %12 : vector<1x64x64xf32> to vector<64x64xf32>
    %14 = vector.extract_strided_slice %11 {offsets = [1, 0, 0], sizes = [1, 64, 64], strides = [1, 1, 1]} : vector<2x64x64xf32> to vector<1x64x64xf32>
    %15 = vector.shape_cast %14 : vector<1x64x64xf32> to vector<64x64xf32>
    %c0_5 = arith.constant 0 : index
    %c0_6 = arith.constant 0 : index
    %16 = vector.load %arg2[%c0_5, %c0_6] : memref<64x64xf32, #tpu.memory_space<vmem>>, vector<64x64xf32>
    %cst_7 = arith.constant 0.000000e+00 : f32
    %17 = vector.broadcast %cst_7 : f32 to vector<1x3x8x64xf32>
    %c0_8 = arith.constant 0 : index
    %c0_9 = arith.constant 0 : index
    %c0_10 = arith.constant 0 : index
    %c0_11 = arith.constant 0 : index
    %18 = vector.load %arg3[%c0_8, %c0_9, %c0_10, %c0_11] : memref<1x3x8x64xf32, #tpu.memory_space<vmem>>, vector<1x3x8x64xf32>
    tpu.vector_store %arg3[%c0_8, %c0_9, %c0_10, %c0_11], %17 {strides = array<i32>} : memref<1x3x8x64xf32, #tpu.memory_space<vmem>>, vector<1x3x8x64xf32>,
    %19 = arith.mulf %13, %16 : vector<64x64xf32>
    %cst_12 = arith.constant dense<0xFF800000> : vector<64xf32>
    %20 = vector.multi_reduction <maximumf>, %19, %cst_12 [1] : vector<64x64xf32> to vector<64xf32>
    %21 = vector.shape_cast %20 : vector<64xf32> to vector<64x1xf32>
    %cst_13 = arith.constant dense<0xFF800000> : vector<1xf32>
    %22 = vector.multi_reduction <maximumf>, %21, %cst_13 [0] : vector<64x1xf32> to vector<1xf32>
    %23 = vector.shape_cast %22 : vector<1xf32> to vector<1x1xf32>
    %24 = vector.broadcast %23 : vector<1x1xf32> to vector<64x64xf32>
    %25 = arith.subf %19, %24 : vector<64x64xf32>
    %26 = math.exp %25 : vector<64x64xf32>
    %cst_14 = arith.constant dense<0.000000e+00> : vector<64xf32>
    %27 = vector.multi_reduction <add>, %26, %cst_14 [1] : vector<64x64xf32> to vector<64xf32>
    %28 = vector.shape_cast %27 : vector<64xf32> to vector<64x1xf32>
    %cst_15 = arith.constant 1.000000e+00 : f32
    %29 = vector.broadcast %cst_15 : f32 to vector<64x1xf32>
    %30 = arith.divf %29, %28 : vector<64x1xf32>
    %cst_16 = arith.constant dense<0.000000e+00> : vector<64xf32>
    %31 = vector.multi_reduction <add>, %26, %cst_16 [0] : vector<64x64xf32> to vector<64xf32>
    %32 = vector.shape_cast %31 : vector<64xf32> to vector<1x64xf32>
    %cst_17 = arith.constant 1.000000e+00 : f32
    %33 = vector.broadcast %cst_17 : f32 to vector<1x64xf32>
    %34 = arith.divf %33, %32 : vector<1x64xf32>
    %35 = vector.broadcast %30 : vector<64x1xf32> to vector<64x64xf32>
    %36 = arith.mulf %26, %35 : vector<64x64xf32>
    %37 = vector.broadcast %34 : vector<1x64xf32> to vector<64x64xf32>
    %38 = arith.mulf %26, %37 : vector<64x64xf32>
    %39 = arith.mulf %36, %38 : vector<64x64xf32>
    %cst_18 = arith.constant dense<0xFF800000> : vector<64xf32>
    %40 = vector.multi_reduction <maximumf>, %39, %cst_18 [0] : vector<64x64xf32> to vector<64xf32>
    %41 = vector.shape_cast %40 : vector<64xf32> to vector<1x64xf32>
    %c0_19 = arith.constant 0 : index
    %c0_20 = arith.constant 0 : index
    %c0_21 = arith.constant 0 : index
    %c0_22 = arith.constant 0 : index
    %42 = vector.load %arg3[%c0_19, %c0_20, %c0_21, %c0_22] : memref<1x3x8x64xf32, #tpu.memory_space<vmem>>, vector<1x1x1x64xf32>
    %43 = vector.shape_cast %42 : vector<1x1x1x64xf32> to vector<1x64xf32>
    %44 = vector.shape_cast %41 : vector<1x64xf32> to vector<1x1x1x64xf32>
    tpu.vector_store %arg3[%c0_19, %c0_20, %c0_21, %c0_22], %44 {strides = array<i32>} : memref<1x3x8x64xf32, #tpu.memory_space<vmem>>, vector<1x1x1x64xf32>,
    %45 = vector.broadcast %41 : vector<1x64xf32> to vector<64x64xf32>
    %46 = arith.cmpf oge, %39, %45 : vector<64x64xf32>
    %cst_23 = arith.constant 0.000000e+00 : f32
    %47 = vector.broadcast %cst_23 : f32 to vector<64x64xf32>
    %48 = arith.select %46, %47, %39 : vector<64x64xi1>, vector<64x64xf32>
    %cst_24 = arith.constant dense<0xFF800000> : vector<64xf32>
    %49 = vector.multi_reduction <maximumf>, %48, %cst_24 [0] : vector<64x64xf32> to vector<64xf32>
    %50 = vector.shape_cast %49 : vector<64xf32> to vector<1x64xf32>
    %c0_25 = arith.constant 0 : index
    %c0_26 = arith.constant 0 : index
    %c1 = arith.constant 1 : index
    %c0_27 = arith.constant 0 : index
    %51 = vector.load %arg3[%c0_25, %c0_26, %c1, %c0_27] : memref<1x3x8x64xf32, #tpu.memory_space<vmem>>, vector<1x1x1x64xf32>
    %52 = vector.shape_cast %51 : vector<1x1x1x64xf32> to vector<1x64xf32>
    %53 = vector.shape_cast %50 : vector<1x64xf32> to vector<1x1x1x64xf32>
    tpu.vector_store %arg3[%c0_25, %c0_26, %c1, %c0_27], %53 {strides = array<i32>} : memref<1x3x8x64xf32, #tpu.memory_space<vmem>>, vector<1x1x1x64xf32>,
    %54 = vector.broadcast %50 : vector<1x64xf32> to vector<64x64xf32>
    %55 = arith.cmpf oge, %48, %54 : vector<64x64xf32>
    %cst_28 = arith.constant 0.000000e+00 : f32
    %56 = vector.broadcast %cst_28 : f32 to vector<64x64xf32>
    %57 = arith.select %55, %56, %48 : vector<64x64xi1>, vector<64x64xf32>
    %cst_29 = arith.constant dense<0xFF800000> : vector<64xf32>
    %58 = vector.multi_reduction <maximumf>, %57, %cst_29 [0] : vector<64x64xf32> to vector<64xf32>
    %59 = vector.shape_cast %58 : vector<64xf32> to vector<1x64xf32>
    %c0_30 = arith.constant 0 : index
    %c0_31 = arith.constant 0 : index
    %c2 = arith.constant 2 : index
    %c0_32 = arith.constant 0 : index
    %60 = vector.load %arg3[%c0_30, %c0_31, %c2, %c0_32] : memref<1x3x8x64xf32, #tpu.memory_space<vmem>>, vector<1x1x1x64xf32>
    %61 = vector.shape_cast %60 : vector<1x1x1x64xf32> to vector<1x64xf32>
    %62 = vector.shape_cast %59 : vector<1x64xf32> to vector<1x1x1x64xf32>
    tpu.vector_store %arg3[%c0_30, %c0_31, %c2, %c0_32], %62 {strides = array<i32>} : memref<1x3x8x64xf32, #tpu.memory_space<vmem>>, vector<1x1x1x64xf32>,
    %63 = arith.mulf %15, %16 : vector<64x64xf32>
    %cst_33 = arith.constant dense<0xFF800000> : vector<64xf32>
    %64 = vector.multi_reduction <maximumf>, %63, %cst_33 [1] : vector<64x64xf32> to vector<64xf32>
    %65 = vector.shape_cast %64 : vector<64xf32> to vector<64x1xf32>
    %cst_34 = arith.constant dense<0xFF800000> : vector<1xf32>
    %66 = vector.multi_reduction <maximumf>, %65, %cst_34 [0] : vector<64x1xf32> to vector<1xf32>
    %67 = vector.shape_cast %66 : vector<1xf32> to vector<1x1xf32>
    %68 = vector.broadcast %67 : vector<1x1xf32> to vector<64x64xf32>
    %69 = arith.subf %63, %68 : vector<64x64xf32>
    %70 = math.exp %69 : vector<64x64xf32>
    %cst_35 = arith.constant dense<0.000000e+00> : vector<64xf32>
    %71 = vector.multi_reduction <add>, %70, %cst_35 [1] : vector<64x64xf32> to vector<64xf32>
    %72 = vector.shape_cast %71 : vector<64xf32> to vector<64x1xf32>
    %cst_36 = arith.constant 1.000000e+00 : f32
    %73 = vector.broadcast %cst_36 : f32 to vector<64x1xf32>
    %74 = arith.divf %73, %72 : vector<64x1xf32>
    %cst_37 = arith.constant dense<0.000000e+00> : vector<64xf32>
    %75 = vector.multi_reduction <add>, %70, %cst_37 [0] : vector<64x64xf32> to vector<64xf32>
    %76 = vector.shape_cast %75 : vector<64xf32> to vector<1x64xf32>
    %cst_38 = arith.constant 1.000000e+00 : f32
    %77 = vector.broadcast %cst_38 : f32 to vector<1x64xf32>
    %78 = arith.divf %77, %76 : vector<1x64xf32>
    %79 = vector.broadcast %74 : vector<64x1xf32> to vector<64x64xf32>
    %80 = arith.mulf %70, %79 : vector<64x64xf32>
    %81 = vector.broadcast %78 : vector<1x64xf32> to vector<64x64xf32>
    %82 = arith.mulf %70, %81 : vector<64x64xf32>
    %83 = arith.mulf %80, %82 : vector<64x64xf32>
    %cst_39 = arith.constant dense<0xFF800000> : vector<64xf32>
    %84 = vector.multi_reduction <maximumf>, %83, %cst_39 [0] : vector<64x64xf32> to vector<64xf32>
    %85 = vector.shape_cast %84 : vector<64xf32> to vector<1x64xf32>
    %c0_40 = arith.constant 0 : index
    %c1_41 = arith.constant 1 : index
    %c0_42 = arith.constant 0 : index
    %c0_43 = arith.constant 0 : index
    %86 = vector.load %arg3[%c0_40, %c1_41, %c0_42, %c0_43] : memref<1x3x8x64xf32, #tpu.memory_space<vmem>>, vector<1x1x1x64xf32>
    %87 = vector.shape_cast %86 : vector<1x1x1x64xf32> to vector<1x64xf32>
    %88 = vector.shape_cast %85 : vector<1x64xf32> to vector<1x1x1x64xf32>
    tpu.vector_store %arg3[%c0_40, %c1_41, %c0_42, %c0_43], %88 {strides = array<i32>} : memref<1x3x8x64xf32, #tpu.memory_space<vmem>>, vector<1x1x1x64xf32>,
    %89 = vector.broadcast %85 : vector<1x64xf32> to vector<64x64xf32>
    %90 = arith.cmpf oge, %83, %89 : vector<64x64xf32>
    %cst_44 = arith.constant 0.000000e+00 : f32
    %91 = vector.broadcast %cst_44 : f32 to vector<64x64xf32>
    %92 = arith.select %90, %91, %83 : vector<64x64xi1>, vector<64x64xf32>
    %cst_45 = arith.constant dense<0xFF800000> : vector<64xf32>
    %93 = vector.multi_reduction <maximumf>, %92, %cst_45 [0] : vector<64x64xf32> to vector<64xf32>
    %94 = vector.shape_cast %93 : vector<64xf32> to vector<1x64xf32>
    %c0_46 = arith.constant 0 : index
    %c1_47 = arith.constant 1 : index
    %c1_48 = arith.constant 1 : index
    %c0_49 = arith.constant 0 : index
    %95 = vector.load %arg3[%c0_46, %c1_47, %c1_48, %c0_49] : memref<1x3x8x64xf32, #tpu.memory_space<vmem>>, vector<1x1x1x64xf32>
    %96 = vector.shape_cast %95 : vector<1x1x1x64xf32> to vector<1x64xf32>
    %97 = vector.shape_cast %94 : vector<1x64xf32> to vector<1x1x1x64xf32>
    tpu.vector_store %arg3[%c0_46, %c1_47, %c1_48, %c0_49], %97 {strides = array<i32>} : memref<1x3x8x64xf32, #tpu.memory_space<vmem>>, vector<1x1x1x64xf32>,
    %98 = vector.broadcast %94 : vector<1x64xf32> to vector<64x64xf32>
    %99 = arith.cmpf oge, %92, %98 : vector<64x64xf32>
    %cst_50 = arith.constant 0.000000e+00 : f32
    %100 = vector.broadcast %cst_50 : f32 to vector<64x64xf32>
    %101 = arith.select %99, %100, %92 : vector<64x64xi1>, vector<64x64xf32>
    %cst_51 = arith.constant dense<0xFF800000> : vector<64xf32>
    %102 = vector.multi_reduction <maximumf>, %101, %cst_51 [0] : vector<64x64xf32> to vector<64xf32>
    %103 = vector.shape_cast %102 : vector<64xf32> to vector<1x64xf32>
    %c0_52 = arith.constant 0 : index
    %c1_53 = arith.constant 1 : index
    %c2_54 = arith.constant 2 : index
    %c0_55 = arith.constant 0 : index
    %104 = vector.load %arg3[%c0_52, %c1_53, %c2_54, %c0_55] : memref<1x3x8x64xf32, #tpu.memory_space<vmem>>, vector<1x1x1x64xf32>
    %105 = vector.shape_cast %104 : vector<1x1x1x64xf32> to vector<1x64xf32>
    %106 = vector.shape_cast %103 : vector<1x64xf32> to vector<1x1x1x64xf32>
    tpu.vector_store %arg3[%c0_52, %c1_53, %c2_54, %c0_55], %106 {strides = array<i32>} : memref<1x3x8x64xf32, #tpu.memory_space<vmem>>, vector<1x1x1x64xf32>,
    %107 = arith.addf %13, %15 : vector<64x64xf32>
    %cst_56 = arith.constant 5.000000e-01 : f32
    %108 = vector.broadcast %cst_56 : f32 to vector<64x64xf32>
    %109 = arith.mulf %107, %108 : vector<64x64xf32>
    %110 = arith.mulf %109, %16 : vector<64x64xf32>
    %cst_57 = arith.constant dense<0xFF800000> : vector<64xf32>
    %111 = vector.multi_reduction <maximumf>, %110, %cst_57 [1] : vector<64x64xf32> to vector<64xf32>
    %112 = vector.shape_cast %111 : vector<64xf32> to vector<64x1xf32>
    %cst_58 = arith.constant dense<0xFF800000> : vector<1xf32>
    %113 = vector.multi_reduction <maximumf>, %112, %cst_58 [0] : vector<64x1xf32> to vector<1xf32>
    %114 = vector.shape_cast %113 : vector<1xf32> to vector<1x1xf32>
    %115 = vector.broadcast %114 : vector<1x1xf32> to vector<64x64xf32>
    %116 = arith.subf %110, %115 : vector<64x64xf32>
    %117 = math.exp %116 : vector<64x64xf32>
    %cst_59 = arith.constant dense<0.000000e+00> : vector<64xf32>
    %118 = vector.multi_reduction <add>, %117, %cst_59 [1] : vector<64x64xf32> to vector<64xf32>
    %119 = vector.shape_cast %118 : vector<64xf32> to vector<64x1xf32>
    %cst_60 = arith.constant 1.000000e+00 : f32
    %120 = vector.broadcast %cst_60 : f32 to vector<64x1xf32>
    %121 = arith.divf %120, %119 : vector<64x1xf32>
    %cst_61 = arith.constant dense<0.000000e+00> : vector<64xf32>
    %122 = vector.multi_reduction <add>, %117, %cst_61 [0] : vector<64x64xf32> to vector<64xf32>
    %123 = vector.shape_cast %122 : vector<64xf32> to vector<1x64xf32>
    %cst_62 = arith.constant 1.000000e+00 : f32
    %124 = vector.broadcast %cst_62 : f32 to vector<1x64xf32>
    %125 = arith.divf %124, %123 : vector<1x64xf32>
    %126 = vector.broadcast %121 : vector<64x1xf32> to vector<64x64xf32>
    %127 = arith.mulf %117, %126 : vector<64x64xf32>
    %128 = vector.broadcast %125 : vector<1x64xf32> to vector<64x64xf32>
    %129 = arith.mulf %117, %128 : vector<64x64xf32>
    %130 = arith.mulf %127, %129 : vector<64x64xf32>
    %cst_63 = arith.constant dense<0xFF800000> : vector<64xf32>
    %131 = vector.multi_reduction <maximumf>, %130, %cst_63 [0] : vector<64x64xf32> to vector<64xf32>
    %132 = vector.shape_cast %131 : vector<64xf32> to vector<1x64xf32>
    %c0_64 = arith.constant 0 : index
    %c2_65 = arith.constant 2 : index
    %c0_66 = arith.constant 0 : index
    %c0_67 = arith.constant 0 : index
    %133 = vector.load %arg3[%c0_64, %c2_65, %c0_66, %c0_67] : memref<1x3x8x64xf32, #tpu.memory_space<vmem>>, vector<1x1x1x64xf32>
    %134 = vector.shape_cast %133 : vector<1x1x1x64xf32> to vector<1x64xf32>
    %135 = vector.shape_cast %132 : vector<1x64xf32> to vector<1x1x1x64xf32>
    tpu.vector_store %arg3[%c0_64, %c2_65, %c0_66, %c0_67], %135 {strides = array<i32>} : memref<1x3x8x64xf32, #tpu.memory_space<vmem>>, vector<1x1x1x64xf32>,
    %136 = vector.broadcast %132 : vector<1x64xf32> to vector<64x64xf32>
    %137 = arith.cmpf oge, %130, %136 : vector<64x64xf32>
    %cst_68 = arith.constant 0.000000e+00 : f32
    %138 = vector.broadcast %cst_68 : f32 to vector<64x64xf32>
    %139 = arith.select %137, %138, %130 : vector<64x64xi1>, vector<64x64xf32>
    %cst_69 = arith.constant dense<0xFF800000> : vector<64xf32>
    %140 = vector.multi_reduction <maximumf>, %139, %cst_69 [0] : vector<64x64xf32> to vector<64xf32>
    %141 = vector.shape_cast %140 : vector<64xf32> to vector<1x64xf32>
    %c0_70 = arith.constant 0 : index
    %c2_71 = arith.constant 2 : index
    %c1_72 = arith.constant 1 : index
    %c0_73 = arith.constant 0 : index
    %142 = vector.load %arg3[%c0_70, %c2_71, %c1_72, %c0_73] : memref<1x3x8x64xf32, #tpu.memory_space<vmem>>, vector<1x1x1x64xf32>
    %143 = vector.shape_cast %142 : vector<1x1x1x64xf32> to vector<1x64xf32>
    %144 = vector.shape_cast %141 : vector<1x64xf32> to vector<1x1x1x64xf32>
    tpu.vector_store %arg3[%c0_70, %c2_71, %c1_72, %c0_73], %144 {strides = array<i32>} : memref<1x3x8x64xf32, #tpu.memory_space<vmem>>, vector<1x1x1x64xf32>,
    %145 = vector.broadcast %141 : vector<1x64xf32> to vector<64x64xf32>
    %146 = arith.cmpf oge, %139, %145 : vector<64x64xf32>
    %cst_74 = arith.constant 0.000000e+00 : f32
    %147 = vector.broadcast %cst_74 : f32 to vector<64x64xf32>
    %148 = arith.select %146, %147, %139 : vector<64x64xi1>, vector<64x64xf32>
    %cst_75 = arith.constant dense<0xFF800000> : vector<64xf32>
    %149 = vector.multi_reduction <maximumf>, %148, %cst_75 [0] : vector<64x64xf32> to vector<64xf32>
    %150 = vector.shape_cast %149 : vector<64xf32> to vector<1x64xf32>
    %c0_76 = arith.constant 0 : index
    %c2_77 = arith.constant 2 : index
    %c2_78 = arith.constant 2 : index
    %c0_79 = arith.constant 0 : index
    %151 = vector.load %arg3[%c0_76, %c2_77, %c2_78, %c0_79] : memref<1x3x8x64xf32, #tpu.memory_space<vmem>>, vector<1x1x1x64xf32>
    %152 = vector.shape_cast %151 : vector<1x1x1x64xf32> to vector<1x64xf32>
    %153 = vector.shape_cast %150 : vector<1x64xf32> to vector<1x1x1x64xf32>
    tpu.vector_store %arg3[%c0_76, %c2_77, %c2_78, %c0_79], %153 {strides = array<i32>} : memref<1x3x8x64xf32, #tpu.memory_space<vmem>>, vector<1x1x1x64xf32>,
    return
  }
  func.func @transform_0(%arg0: i32) -> (i32, i32, i32, i32) {
    %c0_i32 = arith.constant 0 : i32
    %c0_i32_0 = arith.constant 0 : i32
    %c0_i32_1 = arith.constant 0 : i32
    %c0_i32_2 = arith.constant 0 : i32
    return %arg0, %c0_i32, %c0_i32_0, %c0_i32_1 : i32, i32, i32, i32
  }
  func.func @transform_1(%arg0: i32) -> (i32, i32) {
    %c0_i32 = arith.constant 0 : i32
    %c0_i32_0 = arith.constant 0 : i32
    %c0_i32_1 = arith.constant 0 : i32
    return %c0_i32, %c0_i32_0 : i32, i32
  }
  func.func @transform_2(%arg0: i32) -> (i32, i32, i32, i32) {
    %c0_i32 = arith.constant 0 : i32
    %c0_i32_0 = arith.constant 0 : i32
    %c0_i32_1 = arith.constant 0 : i32
    %c0_i32_2 = arith.constant 0 : i32
    return %arg0, %c0_i32, %c0_i32_0, %c0_i32_1 : i32, i32, i32, i32
  }
}

</mosaic_0001>

<bundles_post_ra>
// kernel: tpu_custom_call.1
= control target key start
LH: loop header
LB: loop body
LE: loop exit
PB: predicated region body
PF: predicated region fallthrough
CT: control target
= control target key end

     0   :  { %7 = vsyncpa [#allocation3], 0  ;;  %s2535_s0 = inlined_call_operand.vmem [shape: f32[2,2,64,32], index: 0, kind: input, shape index: {}]   ;;  %s2536_s1 = inlined_call_operand.vmem [shape: f32[64,64], index: 1, kind: input, shape index: {}]   ;;  %s2537_s2 = inlined_call_operand.hbm [shape: f32[2,3,8,64], index: 2, kind: output, shape index: {}]  }
   0x1   :  { %9 = vsyncpa [#allocation3 + $0x1], 0  ;;  %s1620_s9 = smov 0   ;;  %s1622_s10 = smov 0  }
   0x2   :  { %s1624_s11 = smov 0   ;;  %s1626_s12 = smov 0  }
   0x3 LB: > { %s1641_s13 = sadd.s32 4294967295, %s1599_s12   ;;  %s1279_s14 = sadd.s32 4294967294, %s1599_s12   ;;  %s1599_s12 = sphi %s1626_s12, %s2543_s12   ;;  %s1595_s11 = sphi %s1624_s11, %s2542_s11   ;;  %s1591_s10 = sphi %s1622_s10, %s2541_s10   ;;  %s1587_s9 = sphi %s1620_s9, %s2540_s9  }
   0x4   : > { %s1645_s15 = sadd.s32 1, %s1599_s12   ;;  %s69_s16 = sadd.s32 1, %s1595_s11 }
   0x5   : > { %s66_s17 = ssub.s32 %s1599_s12, %s1645_s15  ;;  %p79_p0 = scmp.ne.s32.totalorder %s1595_s11, %s1591_s10 }
   0x6   : > { %p67_p1 = scmp.eq.s32.totalorder %s66_s17, 0  ;;  %p80_p2 = scmp.eq.s32.totalorder %s1641_s13, 1 }
   0x7   : > { %p85_p3 = scmp.ne.s32.totalorder %s1591_s10, %s1587_s9  ;;  %p86_p4 = scmp.eq.s32.totalorder %s1279_s14, 1 }
   0x8   : > { %s1656_s18 = scalar_select %p67_p1, %s1595_s11, %s69_s16  }
   0x9   : > { %p1658_p5 = por %p80_p2, %p79_p0  ;;  %p1662_p6 = por %p86_p4, %p85_p3 }
   0xa   : > { %p1282_p7 = scmp.ge.s32.totalorder %s1599_s12, 1  ;;  %p115_p8 = scmp.lt.s32.totalorder %s1599_s12, 3 }
   0xc   : > { %p116_p9 = pnand %p1282_p7, %p115_p8 }
   0xd   : > { %p137_p10 = scmp.lt.s32.totalorder (!%p116_p9), %s1641_s13, 1  ;;  %vm175_vm0 = vcmask (!%p116_p9), 261120   ;;  %vm442_vm1 = vcmask (!%p116_p9), 523264   ;;  %s134_s23 = sand.u32 (!%p116_p9), 1, %s1591_s10   ;;  %vm615_vm2 = vcmask (!%p116_p9), 516096  }
   0xe   : > { %119 = sbr.rel (%p116_p9) target bundleno = 957 (0x3bd), region = 28  ;;  %s2494_s3 = scalar_lea.sflag (!%p116_p9), [#allocation3], %s134_s23 }
   0xf   : > { %s1359_s24 = smul.u32 (!%p116_p9), 24, %s134_s23  ;;  %s1602_s4 = smov (!%p116_p9), [#allocation2]  }
  0x10   : > { %s1360_s26 = smul.u32 (!%p116_p9), 384, %s1641_s13  ;;  %s1541_s5 = sshll.u32 (!%p116_p9), %s1602_s4, 4  ;;  %s1542_s5 = int_to_ptr.vmem [resolvable:$false] %s1541_s5 }
  0x11   : > { %s1543_s6 = scalar_lea.vmem (!%p116_p9), %s1542_s5, 768 }
  0x12   : > { %s2486_s30 = scalar_lea.hbm (!%p116_p9), %s2537_s2, %s1360_s26 }
  0x15   : > { %s138_s21 = scalar_select %p137_p10, %s1641_s13, 1 }
  0x17   : > { %s1302_s22 = sshll.u32 %s138_s21, 7 }
  0x18   : > { %s1673_s25 = scalar_lea.vmem %s2535_s0, %s1302_s22 }
  0x19   : > { %v1676_v0 = vld [vmem:[%s1673_s25 + $0x40] sm:$0xff]  ;;  %v1682_v2 = vld [vmem:[%s1673_s25 + $0x48] sm:$0xff]  ;;  %v1696_v8 = vld [vmem:[%s1673_s25 + $0x18] sm:$0xff] }
  0x1a   : > { %v1679_v1 = vld [vmem:[%s1673_s25] sm:$0xff]  ;;  %v167_v3 = vmul.f32 %v1676_v0, %v1676_v0  ;;  %v168_v5 = vmul.f32 %v1682_v2, %v1682_v2  ;;  %v1691_v6 = vld [vmem:[%s1673_s25 + $0x8] sm:$0xff]  ;;  %v1699_v9 = vld [vmem:[%s1673_s25 + $0x10] sm:$0xff]  ;;  %v162_v14 = vmul.f32 %v1696_v8, %v1696_v8 }
  0x1b   : > { %v159_v4 = vmul.f32 %v1679_v1, %v1679_v1  ;;  %v160_v7 = vmul.f32 %v1691_v6, %v1691_v6  ;;  %v161_v15 = vmul.f32 %v1699_v9, %v1699_v9  ;;  %v1710_v16 = vld [vmem:[%s1673_s25 + $0x58] sm:$0xff]  ;;  %v1713_v17 = vld [vmem:[%s1673_s25 + $0x50] sm:$0xff]  ;;  %v1722_v22 = vld [vmem:[%s1673_s25 + $0x28] sm:$0xff] }
  0x1c   : > { %v200_v10 = vsel %vm175_vm0, %v167_v3, 0.0  ;;  %v203_v12 = vsel %vm175_vm0, %v168_v5, 0.0  ;;  %v185_v18 = vsel %vm175_vm0, %v162_v14, 0.0  ;;  %v170_v20 = vmul.f32 %v1710_v16, %v1710_v16  ;;  %v1725_v23 = vld [vmem:[%s1673_s25 + $0x20] sm:$0xff]  ;;  %v1734_v28 = vld [vmem:[%s1673_s25 + $0x68] sm:$0xff]  ;;  %v1746_v34 = vld [vmem:[%s1673_s25 + $0x38] sm:$0xff] }
  0x1d   : > { %v176_v11 = vsel %vm175_vm0, %v159_v4, 0.0  ;;  %201 = vadd.xlane.f32.xlu1 %v200_v10  ;;  %v179_v13 = vsel %vm175_vm0, %v160_v7, 0.0  ;;  %v182_v19 = vsel %vm175_vm0, %v161_v15, 0.0  ;;  %v169_v21 = vmul.f32 %v1713_v17, %v1713_v17  ;;  %v1737_v29 = vld [vmem:[%s1673_s25 + $0x60] sm:$0xff]  ;;  %v1749_v35 = vld [vmem:[%s1673_s25 + $0x30] sm:$0xff]  ;;  %v1758_v40 = vld [vmem:[%s1673_s25 + $0x78] sm:$0xff] }
  0x1e   : > { %177 = vadd.xlane.f32.xlu0 %v176_v11  ;;  %v209_v24 = vsel %vm175_vm0, %v170_v20, 0.0  ;;  %v164_v26 = vmul.f32 %v1722_v22, %v1722_v22  ;;  %v163_v27 = vmul.f32 %v1725_v23, %v1725_v23  ;;  %v172_v32 = vmul.f32 %v1734_v28, %v1734_v28  ;;  %v1761_v41 = vld [vmem:[%s1673_s25 + $0x70] sm:$0xff]  ;;  %s2067_s25 = scalar_lea.vmem [#allocation2], %s1359_s24 }
  0x1f   : > { %v206_v25 = vsel %vm175_vm0, %v169_v21, 0.0  ;;  %v171_v33 = vmul.f32 %v1737_v29, %v1737_v29  ;;  %v166_v38 = vmul.f32 %v1746_v34, %v1746_v34  ;;  %v165_v39 = vmul.f32 %v1749_v35, %v1749_v35  ;;  %s1217_s27 = sshll.u32 %s2067_s25, 4  ;;  %s2488_s27 = int_to_ptr.vmem [resolvable:$true] %s1217_s27 }
  0x20   : > { %v191_v30 = vsel %vm175_vm0, %v164_v26, 0.0  ;;  %v188_v31 = vsel %vm175_vm0, %v163_v27, 0.0  ;;  %v215_v36 = vsel %vm175_vm0, %v172_v32, 0.0  ;;  %v174_v44 = vmul.f32 %v1758_v40, %v1758_v40  ;;  %s1537_s13 = scalar_lea.vmem %s2488_s27, 384  ;;  %p1544_p0 = scmp.lt.s32.totalorder %s2488_s27, %s1542_s5 }
  0x21   : > { %204 = vadd.xlane.f32.xlu1 %v203_v12  ;;  %v212_v37 = vsel %vm175_vm0, %v171_v33, 0.0  ;;  %v197_v42 = vsel %vm175_vm0, %v166_v38, 0.0  ;;  %v194_v43 = vsel %vm175_vm0, %v165_v39, 0.0  ;;  %v173_v45 = vmul.f32 %v1761_v41, %v1761_v41  ;;  %p1538_p11 = scmp.ne.s32.totalorder %s2488_s27, %s1537_s13  ;;  %p1545_p1 = scmp.lt.s32.totalorder %s1543_s6, %s1537_s13 }
  0x22   : > { %180 = vadd.xlane.f32.xlu0 %v179_v13  ;;  %v221_v46 = vsel %vm175_vm0, %v174_v44, 0.0 }
  0x23   : > { %v218_v47 = vsel %vm175_vm0, %v173_v45, 0.0  ;;  %p1539_p12 = pnand %p1538_p11, %p1658_p5  ;;  %p1546_p2 = por %p1545_p1, %p1544_p0 }
  0x25   : > { %186 = vadd.xlane.f32.xlu1 %v185_v18  ;;  %p1540_p13 = pneg %p1539_p12 }
  0x26   : > { %183 = vadd.xlane.f32.xlu0 %v182_v19 }
  0x27   : > { %p1547_p3 = pnand %p1546_p2, %p1540_p13 }
  0x29   : > { %210 = vadd.xlane.f32.xlu1 %v209_v24 }
  0x2a   : > { %207 = vadd.xlane.f32.xlu0 %v206_v25 }
  0x2d   : > { %192 = vadd.xlane.f32.xlu1 %v191_v30 }
  0x2e   : > { %189 = vadd.xlane.f32.xlu0 %v188_v31 }
  0x31   : > { %216 = vadd.xlane.f32.xlu1 %v215_v36 }
  0x32   : > { %213 = vadd.xlane.f32.xlu0 %v212_v37 }
  0x35   : > { %198 = vadd.xlane.f32.xlu1 %v197_v42 }
  0x36   : > { %195 = vadd.xlane.f32.xlu0 %v194_v43 }
  0x39   : > { %222 = vadd.xlane.f32.xlu1 %v221_v46 }
  0x3a   : > { %219 = vadd.xlane.f32.xlu0 %v218_v47 }
  0xaa   : > { %v202_v48 = vpop.xlane.xlu1 %201 }
  0xab   : > { %v178_v49 = vpop.xlane.xlu0 %177  ;;  %v232_v50 = vmax.f32 %v202_v48, 1e-24 }
  0xac   : > { %v224_v51 = vmax.f32 %v178_v49, 1e-24 }
  0xad   : > { %1403 = vrsqrt.f32 %v232_v50 }
  0xae   : > { %v205_v52 = vpop.xlane.xlu1 %204  ;;  %1405 = vrsqrt.f32 %v224_v51 }
  0xaf   : > { %v181_v53 = vpop.xlane.xlu0 %180  ;;  %v233_v54 = vmax.f32 %v205_v52, 1e-24 }
  0xb0   : > { %v225_v55 = vmax.f32 %v181_v53, 1e-24 }
  0xb1   : > { %1407 = vrsqrt.f32 %v233_v54 }
  0xb2   : > { %1409 = vrsqrt.f32 %v225_v55  ;;  %v187_v56 = vpop.xlane.xlu1 %186 }
  0xb3   : > { %v184_v57 = vpop.xlane.xlu0 %183  ;;  %v227_v58 = vmax.f32 %v187_v56, 1e-24 }
  0xb4   : > { %v226_v59 = vmax.f32 %v184_v57, 1e-24 }
  0xb5   : > { %1411 = vrsqrt.f32 %v227_v58 }
  0xb6   : > { %1413 = vrsqrt.f32 %v226_v59  ;;  %v211_v60 = vpop.xlane.xlu1 %210 }
  0xb7   : > { %v208_v61 = vpop.xlane.xlu0 %207  ;;  %v1404_v62 = vpop.eup %1403  ;;  %v235_v63 = vmax.f32 %v211_v60, 1e-24 }
  0xb8   : > { %v234_v3 = vmax.f32 %v208_v61, 1e-24  ;;  %v1406_v4 = vpop.eup %1405  ;;  %v264_v10 = vmul.f32 %v1404_v62, %v1676_v0 }
  0xb9   : > { %1415 = vrsqrt.f32 %v235_v63  ;;  %v256_v18 = vmul.f32 %v1406_v4, %v1679_v1 }
  0xba   : > { %1417 = vrsqrt.f32 %v234_v3  ;;  %v193_v5 = vpop.xlane.xlu1 %192 }
  0xbb   : > { %v190_v7 = vpop.xlane.xlu0 %189  ;;  %v1408_v11 = vpop.eup %1407  ;;  %v229_v12 = vmax.f32 %v193_v5, 1e-24 }
  0xbc   : > { %v228_v13 = vmax.f32 %v190_v7, 1e-24  ;;  %v1410_v14 = vpop.eup %1409  ;;  %v265_v15 = vmul.f32 %v1408_v11, %v1682_v2  ;;  %v437_v7 = vld [vmem:[%s2536_s1 + $0x18] sm:$0xff] }
  0xbd   : > { %1419 = vrsqrt.f32 %v229_v12  ;;  %v257_v19 = vmul.f32 %v1410_v14, %v1691_v6 }
  0xbe   : > { %1421 = vrsqrt.f32 %v228_v13  ;;  %v217_v20 = vpop.xlane.xlu1 %216  ;;  %v276_v24 = vpack.c.bf16 %v265_v15, %v264_v10 }
  0xbf   : > { %v214_v21 = vpop.xlane.xlu0 %213  ;;  %v1412_v25 = vpop.eup %1411  ;;  %v237_v26 = vmax.f32 %v217_v20, 1e-24  ;;  %v272_v30 = vpack.c.bf16 %v257_v19, %v256_v18 }
  0xc0   : > { %v236_v27 = vmax.f32 %v214_v21, 1e-24  ;;  %v1414_v0 = vpop.eup %1413  ;;  %1355 = vmatprep.subr.msk.bf16.mxu1 %vm175_vm0, %v276_v24  ;;  %1343 = vmatprep.mubr.msk.bf16.mxu1 %vm175_vm0, %v276_v24  ;;  %v358_v2 = vsel %vm175_vm0, %v276_v24, 0  ;;  %v259_v31 = vmul.f32 %v1412_v25, %v1696_v8 }
  0xc1   : > { %1423 = vrsqrt.f32 %v237_v26  ;;  %1351 = vmatprep.subr.msk.bf16.mxu0 %vm175_vm0, %v272_v30  ;;  %1327 = vmatprep.mubr.msk.bf16.mxu0 %vm175_vm0, %v272_v30  ;;  %v281_v1 = vsel %vm175_vm0, %v272_v30, 0  ;;  %v258_v6 = vmul.f32 %v1414_v0, %v1699_v9 }
  0xc2   : > { %1425 = vrsqrt.f32 %v236_v27  ;;  %1320 = vmatpush3.bf16.xpose.msra.mxu0 %v281_v1  ;;  %1336 = vmatpush3.bf16.xpose.msra.mxu1 %v358_v2  ;;  %v199_v32 = vpop.xlane.xlu1 %198  ;;  %v434_v27 = vld [vmem:[%s2536_s1] sm:$0xff] }
  0xc3   : > { %v196_v33 = vpop.xlane.xlu0 %195  ;;  %v1416_v36 = vpop.eup %1415  ;;  %v231_v37 = vmax.f32 %v199_v32, 1e-24  ;;  %v273_v39 = vpack.c.bf16 %v259_v31, %v258_v6  ;;  %v435_v31 = vld [vmem:[%s2536_s1 + $0x8] sm:$0xff] }
  0xc4   : > { %v230_v38 = vmax.f32 %v196_v33, 1e-24  ;;  %v1418_v42 = vpop.eup %1417  ;;  %v267_v8 = vmul.f32 %v1416_v36, %v1710_v16 }
  0xc5   : > { %1427 = vrsqrt.f32 %v231_v37  ;;  %1352 = vmatprep.subr.msk.bf16.mxu0 %vm175_vm0, %v273_v39  ;;  %v266_v43 = vmul.f32 %v1418_v42, %v1713_v17  ;;  %v284_v49 = vsel %vm175_vm0, %v273_v39, 0 }
  0xc6   : > { %1429 = vrsqrt.f32 %v230_v38  ;;  %v223_v44 = vpop.xlane.xlu1 %222 }
  0xc7   : > { %v220_v9 = vpop.xlane.xlu0 %219  ;;  %v1420_v45 = vpop.eup %1419  ;;  %v239_v46 = vmax.f32 %v223_v44, 1e-24  ;;  %v277_v48 = vpack.c.bf16 %v267_v8, %v266_v43 }
  0xc8   : > { %v238_v47 = vmax.f32 %v220_v9, 1e-24  ;;  %v1422_v50 = vpop.eup %1421  ;;  %v261_v51 = vmul.f32 %v1420_v45, %v1722_v22 }
  0xc9   : > { %1431 = vrsqrt.f32 %v239_v46  ;;  %1356 = vmatprep.subr.msk.bf16.mxu1 %vm175_vm0, %v277_v48  ;;  %v361_v16 = vsel %vm175_vm0, %v277_v48, 0  ;;  %v260_v52 = vmul.f32 %v1422_v50, %v1725_v23 }
  0xca   : > { %1433 = vrsqrt.f32 %v238_v47  ;;  %1322 = vmatpush3.bf16.xpose.msra.mxu0 %v284_v49  ;;  %1338 = vmatpush3.bf16.xpose.msra.mxu1 %v361_v16 }
  0xcb   : > { %v1424_v17 = vpop.eup %1423  ;;  %v274_v53 = vpack.c.bf16 %v261_v51, %v260_v52 }
  0xcc   : > { %v1426_v54 = vpop.eup %1425  ;;  %v269_v55 = vmul.f32 %v1424_v17, %v1734_v28 }
  0xcd   : > { %1353 = vmatprep.subr.msk.bf16.mxu0 %vm175_vm0, %v274_v53  ;;  %v268_v56 = vmul.f32 %v1426_v54, %v1737_v29  ;;  %v287_v58 = vsel %vm175_vm0, %v274_v53, 0 }
  0xcf   : > { %v1428_v22 = vpop.eup %1427  ;;  %v278_v57 = vpack.c.bf16 %v269_v55, %v268_v56 }
  0xd0   : > { %v1430_v59 = vpop.eup %1429  ;;  %v263_v60 = vmul.f32 %v1428_v22, %v1746_v34 }
  0xd1   : > { %1357 = vmatprep.subr.msk.bf16.mxu1 %vm175_vm0, %v278_v57  ;;  %v364_v23 = vsel %vm175_vm0, %v278_v57, 0  ;;  %v262_v61 = vmul.f32 %v1430_v59, %v1749_v35  ;;  %v436_v35 = vld [vmem:[%s2536_s1 + $0x10] sm:$0xff] }
  0xd2   : > { %1324 = vmatpush3.bf16.xpose.msra.mxu0 %v287_v58  ;;  %1340 = vmatpush3.bf16.xpose.msra.mxu1 %v364_v23  ;;  %v440_v23 = vld [vmem:[%s2536_s1 + $0x30] sm:$0xff] }
  0xd3   : > { %v1432_v28 = vpop.eup %1431  ;;  %v275_v62 = vpack.c.bf16 %v263_v60, %v262_v61  ;;  %v441_v61 = vld [vmem:[%s2536_s1 + $0x38] sm:$0xff] }
  0xd4   : > { %v1434_v63 = vpop.eup %1433  ;;  %v271_v29 = vmul.f32 %v1432_v28, %v1758_v40 }
  0xd5   : > { %1354 = vmatprep.subr.msk.bf16.mxu0 %vm175_vm0, %v275_v62  ;;  %v270_v3 = vmul.f32 %v1434_v63, %v1761_v41  ;;  %v290_v34 = vsel %vm175_vm0, %v275_v62, 0 }
  0xd7   : > { %v279_v4 = vpack.c.bf16 %v271_v29, %v270_v3 }
  0xd9   : > { %1358 = vmatprep.subr.msk.bf16.mxu1 %vm175_vm0, %v279_v4  ;;  %v367_v5 = vsel %vm175_vm0, %v279_v4, 0 }
  0xda   : > { %1326 = vmatpush3.bf16.xpose.msra.mxu0 %v290_v34  ;;  %1342 = vmatpush3.bf16.xpose.msra.mxu1 %v367_v5 }
  0xe1   : > { %1328 = vmatmul.mubr.msk.bf16.vlgmr.msra.gmra.mrb[0].mxu0 %vm175_vm0, %v273_v39  ;;  %1344 = vmatmul.mubr.msk.bf16.vlgmr.msra.gmra.mrb[0].mxu1 %vm175_vm0, %v277_v48 }
  0xe2   : > { %1331 = vmatprep.mubr.msk.bf16.mxu0 %vm175_vm0, %v274_v53  ;;  %1347 = vmatprep.mubr.msk.bf16.mxu1 %vm175_vm0, %v278_v57 }
  0xe9   : > { %1332 = vmatmul.mubr.msk.bf16.gmra.mrb[4].mxu0 %vm175_vm0, %v275_v62  ;;  %1348 = vmatmul.mubr.msk.bf16.gmra.mrb[4].mxu1 %vm175_vm0, %v279_v4 }
 0x1b4   : > { %v1329_v40 = vpop.f32.mrb[0].mxu0  ;;  %v1345_v41 = vpop.f32.mrb[0].mxu1 }
 0x1b5   : > { %v1817_v10 = vmul.f32 %v1329_v40, %v436_v35  ;;  %v942_v11 = vadd.f32 %v1345_v41, %v1329_v40  ;;  %v326_v12 = vpop.f32.mrb[1].mxu0  ;;  %v403_v13 = vpop.f32.mrb[1].mxu1  ;;  %v1821_v26 = vmul.f32 %v1345_v41, %v436_v35  ;;  %v439_v40 = vld [vmem:[%s2536_s1 + $0x28] sm:$0xff] }
 0x1b6   : > { %v940_v14 = vadd.f32 %v403_v13, %v326_v12  ;;  %v1330_v15 = vpop.f32.mrb[2].mxu0  ;;  %v1346_v18 = vpop.f32.mrb[2].mxu1  ;;  %v1835_v1 = vmul.f32 %v434_v27, %v326_v12  ;;  %v1845_v48 = vmul.f32 %v434_v27, %v403_v13 }
 0x1b7   : > { %v1819_v19 = vmul.f32 %v1330_v15, %v437_v7  ;;  %v943_v20 = vadd.f32 %v1346_v18, %v1330_v15  ;;  %v329_v21 = vpop.f32.mrb[3].mxu0  ;;  %v406_v24 = vpop.f32.mrb[3].mxu1  ;;  %v1826_v30 = vmul.f32 %v1346_v18, %v437_v7  ;;  %v460_v0 = vsel %vm442_vm1, %v1817_v10, -inf }
 0x1b8   : > { %v941_v25 = vadd.f32 %v406_v24, %v329_v21  ;;  %461 = vmax.xlane.f32.xlu0 %v460_v0  ;;  %v1837_v33 = vmul.f32 %v435_v31, %v329_v21  ;;  %v707_v36 = vsel %vm442_vm1, %v1821_v26, -inf  ;;  %v950_v47 = vmul.f32 0.5, %v942_v11 }
 0x1b9   : > { %v463_v2 = vsel %vm442_vm1, %v1819_v19, -inf  ;;  %v710_v42 = vsel %vm442_vm1, %v1826_v30, -inf  ;;  %v951_v50 = vmul.f32 0.5, %v943_v20  ;;  %v1847_v51 = vmul.f32 %v435_v31, %v406_v24 }
 0x1ba   : > { %464 = vmax.xlane.f32.xlu1 %v463_v2  ;;  %v454_v16 = vsel %vm442_vm1, %v1835_v1, -inf  ;;  %v457_v52 = vsel %vm442_vm1, %v1837_v33, -inf  ;;  %v948_v17 = vmul.f32 0.5, %v940_v14  ;;  %v949_v53 = vmul.f32 0.5, %v941_v25 }
 0x1bb   : > { %v701_v54 = vsel %vm442_vm1, %v1845_v48, -inf  ;;  %v704_v55 = vsel %vm442_vm1, %v1847_v51, -inf  ;;  %v1857_v56 = vmul.f32 %v950_v47, %v436_v35  ;;  %v1859_v22 = vmul.f32 %v951_v50, %v437_v7  ;;  %v438_v35 = vld [vmem:[%s2536_s1 + $0x20] sm:$0xff] }
 0x1bc   : > { %v1333_v6 = vpop.f32.mrb[4].mxu0  ;;  %v1349_v32 = vpop.f32.mrb[4].mxu1  ;;  %708 = vmax.xlane.f32.xlu0 %v707_v36  ;;  %v1865_v59 = vmul.f32 %v948_v17, %v434_v27  ;;  %v1867_v60 = vmul.f32 %v949_v53, %v435_v31 }
 0x1bd   : > { %v1841_v37 = vadd.f32 %v1349_v32, %v1333_v6  ;;  %v342_v38 = vpop.f32.mrb[5].mxu0  ;;  %v419_v39 = vpop.f32.mrb[5].mxu1  ;;  %v970_v57 = vsel %vm442_vm1, %v1857_v56, -inf  ;;  %v973_v58 = vsel %vm442_vm1, %v1859_v22, -inf  ;;  %v1875_v28 = vmul.f32 %v1333_v6, %v440_v23 }
 0x1be   : > { %v944_v8 = vadd.f32 %v419_v39, %v342_v38  ;;  %v1334_v43 = vpop.f32.mrb[6].mxu0  ;;  %711 = vmax.xlane.f32.xlu1 %v710_v42  ;;  %v1350_v44 = vpop.f32.mrb[6].mxu1  ;;  %v964_v63 = vsel %vm442_vm1, %v1865_v59, -inf  ;;  %v967_v29 = vsel %vm442_vm1, %v1867_v60, -inf  ;;  %v1883_v3 = vmul.f32 %v1349_v32, %v440_v23 }
 0x1bf   : > { %v947_v9 = vadd.f32 %v1350_v44, %v1334_v43  ;;  %v345_v45 = vpop.f32.mrb[7].mxu0  ;;  %v422_v46 = vpop.f32.mrb[7].mxu1  ;;  %v1877_v62 = vmul.f32 %v1334_v43, %v441_v61  ;;  %v1885_v4 = vmul.f32 %v1350_v44, %v441_v61  ;;  %v472_v34 = vsel %vm442_vm1, %v1875_v28, -inf }
 0x1c0   : > { %v945_v49 = vadd.f32 %v422_v46, %v345_v45  ;;  %455 = vmax.xlane.f32.xlu0 %v454_v16  ;;  %v1897_v41 = vmul.f32 %v438_v35, %v342_v38  ;;  %v1899_v7 = vmul.f32 %v439_v40, %v345_v45  ;;  %v719_v11 = vsel %vm442_vm1, %v1883_v3, -inf }
 0x1c1   : > { %v475_v5 = vsel %vm442_vm1, %v1877_v62, -inf  ;;  %v722_v12 = vsel %vm442_vm1, %v1885_v4, -inf  ;;  %v1905_v13 = vmul.f32 %v438_v35, %v419_v39  ;;  %v952_v14 = vmul.f32 0.5, %v944_v8 }
 0x1c2   : > { %458 = vmax.xlane.f32.xlu1 %v457_v52  ;;  %v1907_v15 = vmul.f32 %v439_v40, %v422_v46  ;;  %v953_v18 = vmul.f32 0.5, %v945_v49  ;;  %v466_v20 = vsel %vm442_vm1, %v1897_v41, -inf  ;;  %v469_v21 = vsel %vm442_vm1, %v1899_v7, -inf }
 0x1c3   : > { %v954_v24 = vmul.f32 0.5, %v1841_v37  ;;  %v955_v25 = vmul.f32 0.5, %v947_v9  ;;  %v713_v27 = vsel %vm442_vm1, %v1905_v13, -inf  ;;  %v1918_v2 = vmul.f32 %v952_v14, %v438_v35 }
 0x1c4   : > { %702 = vmax.xlane.f32.xlu0 %v701_v54  ;;  %v716_v0 = vsel %vm442_vm1, %v1907_v15, -inf  ;;  %v1920_v31 = vmul.f32 %v953_v18, %v439_v40 }
 0x1c5   : > { %v976_v6 = vsel %vm442_vm1, %v1918_v2, -inf  ;;  %v1926_v36 = vmul.f32 %v954_v24, %v440_v23  ;;  %v1928_v37 = vmul.f32 %v955_v25, %v441_v61 }
 0x1c6   : > { %705 = vmax.xlane.f32.xlu1 %v704_v55  ;;  %v979_v32 = vsel %vm442_vm1, %v1920_v31, -inf }
 0x1c7   : > { %v982_v38 = vsel %vm442_vm1, %v1926_v36, -inf  ;;  %v985_v39 = vsel %vm442_vm1, %v1928_v37, -inf }
 0x1c8   : > { %971 = vmax.xlane.f32.xlu0 %v970_v57 }
 0x1ca   : > { %974 = vmax.xlane.f32.xlu1 %v973_v58 }
 0x1cc   : > { %965 = vmax.xlane.f32.xlu0 %v964_v63 }
 0x1ce   : > { %968 = vmax.xlane.f32.xlu1 %v967_v29 }
 0x1d0   : > { %473 = vmax.xlane.f32.xlu0 %v472_v34 }
 0x1d2   : > { %476 = vmax.xlane.f32.xlu1 %v475_v5 }
 0x1d4   : > { %720 = vmax.xlane.f32.xlu0 %v719_v11 }
 0x1d6   : > { %723 = vmax.xlane.f32.xlu1 %v722_v12 }
 0x1d8   : > { %467 = vmax.xlane.f32.xlu0 %v466_v20 }
 0x1da   : > { %470 = vmax.xlane.f32.xlu1 %v469_v21 }
 0x1dc   : > { %714 = vmax.xlane.f32.xlu0 %v713_v27 }
 0x1de   : > { %717 = vmax.xlane.f32.xlu1 %v716_v0 }
 0x1e0   : > { %977 = vmax.xlane.f32.xlu0 %v976_v6 }
 0x1e2   : > { %980 = vmax.xlane.f32.xlu1 %v979_v32 }
 0x1e4   : > { %983 = vmax.xlane.f32.xlu0 %v982_v38 }
 0x1e6   : > { %986 = vmax.xlane.f32.xlu1 %v985_v39 }
 0x245   : > { %v462_v42 = vpop.xlane.xlu0 %461 }
 0x247   : > { %v465_v8 = vpop.xlane.xlu1 %464 }
 0x249   : > { %v709_v43 = vpop.xlane.xlu0 %708 }
 0x24b   : > { %v712_v44 = vpop.xlane.xlu1 %711 }
 0x24d   : > { %v456_v9 = vpop.xlane.xlu0 %455 }
 0x24f   : > { %v459_v45 = vpop.xlane.xlu1 %458 }
 0x251   : > { %v703_v46 = vpop.xlane.xlu0 %702 }
 0x253   : > { %v706_v47 = vpop.xlane.xlu1 %705 }
 0x255   : > { %v972_v49 = vpop.xlane.xlu0 %971 }
 0x257   : > { %v975_v50 = vpop.xlane.xlu1 %974 }
 0x259   : > { %v966_v16 = vpop.xlane.xlu0 %965 }
 0x25b   : > { %v969_v52 = vpop.xlane.xlu1 %968 }
 0x25d   : > { %v474_v17 = vpop.xlane.xlu0 %473 }
 0x25e   : > { %v480_v61 = vmax.f32 %v462_v42, %v474_v17 }
 0x25f   : > { %v477_v53 = vpop.xlane.xlu1 %476 }
 0x260   : > { %v481_v57 = vmax.f32 %v465_v8, %v477_v53 }
 0x261   : > { %v721_v54 = vpop.xlane.xlu0 %720 }
 0x262   : > { %v483_v34 = vmax.f32 %v480_v61, %v481_v57  ;;  %v727_v12 = vmax.f32 %v709_v43, %v721_v54 }
 0x263   : > { %v724_v55 = vpop.xlane.xlu1 %723 }
 0x264   : > { %v728_v5 = vmax.f32 %v712_v44, %v724_v55 }
 0x265   : > { %v468_v58 = vpop.xlane.xlu0 %467 }
 0x266   : > { %v478_v63 = vmax.f32 %v456_v9, %v468_v58  ;;  %v730_v21 = vmax.f32 %v727_v12, %v728_v5 }
 0x267   : > { %v471_v23 = vpop.xlane.xlu1 %470 }
 0x268   : > { %v479_v29 = vmax.f32 %v459_v45, %v471_v23 }
 0x269   : > { %v715_v40 = vpop.xlane.xlu0 %714 }
 0x26a   : > { %v482_v35 = vmax.f32 %v478_v63, %v479_v29  ;;  %v725_v18 = vmax.f32 %v703_v46, %v715_v40 }
 0x26b   : > { %v718_v11 = vpop.xlane.xlu1 %717 }
 0x26c   : > { %v484_v14 = vmax.f32 %v482_v35, %v483_v34  ;;  %v726_v20 = vmax.f32 %v706_v47, %v718_v11 }
 0x26d   : > { %v978_v27 = vpop.xlane.xlu0 %977 }
 0x26e   : > { %v485_v24 = vrot.slane %v484_v14, 4  ;;  %v729_v25 = vmax.f32 %v725_v18, %v726_v20  ;;  %v988_v8 = vmax.f32 %v966_v16, %v978_v27 }
 0x26f   : > { %v981_v0 = vpop.xlane.xlu1 %980 }
 0x270   : > { %v486_v6 = vmax.f32 %v484_v14, %v485_v24  ;;  %v731_v32 = vmax.f32 %v729_v25, %v730_v21  ;;  %v989_v42 = vmax.f32 %v969_v52, %v981_v0 }
 0x271   : > { %v984_v9 = vpop.xlane.xlu0 %983 }
 0x272   : > { %v487_v38 = vrot.slane %v486_v6, 2  ;;  %v732_v39 = vrot.slane %v731_v32, 4  ;;  %v990_v53 = vmax.f32 %v972_v49, %v984_v9  ;;  %v992_v47 = vmax.f32 %v988_v8, %v989_v42 }
 0x273   : > { %v987_v44 = vpop.xlane.xlu1 %986 }
 0x274   : > { %v488_v45 = vmax.f32 %v486_v6, %v487_v38  ;;  %v733_v17 = vmax.f32 %v731_v32, %v732_v39  ;;  %v991_v43 = vmax.f32 %v975_v50, %v987_v44 }
 0x276   : > { %v489_v54 = vrot.slane %v488_v45, 1  ;;  %v734_v46 = vrot.slane %v733_v17, 2  ;;  %v993_v55 = vmax.f32 %v990_v53, %v991_v43 }
 0x278   : > { %v490_v57 = vmax.f32 %v488_v45, %v489_v54  ;;  %v735_v58 = vmax.f32 %v733_v17, %v734_v46  ;;  %v994_v23 = vmax.f32 %v992_v47, %v993_v55 }
 0x27a   : > { %v736_v61 = vrot.slane %v735_v58, 1  ;;  %v995_v63 = vrot.slane %v994_v23, 4  ;;  %v492_v29 = vsub.f32 %v1837_v33, %v490_v57  ;;  %v491_v52 = vsub.f32 %v1835_v1, %v490_v57 }
 0x27b   : > { %v494_v16 = vsub.f32 %v1819_v19, %v490_v57  ;;  %v493_v34 = vsub.f32 %v1817_v10, %v490_v57  ;;  %v496_v49 = vsub.f32 %v1899_v7, %v490_v57  ;;  %v495_v50 = vsub.f32 %v1897_v41, %v490_v57 }
 0x27c   : > { %v737_v5 = vmax.f32 %v735_v58, %v736_v61  ;;  %v996_v35 = vmax.f32 %v994_v23, %v995_v63  ;;  %v501_v40 = vmul.f32 1.442695, %v492_v29  ;;  %v499_v11 = vmul.f32 1.442695, %v491_v52 }
 0x27d   : > { %v505_v12 = vmul.f32 1.442695, %v494_v16  ;;  %v503_v14 = vmul.f32 1.442695, %v493_v34  ;;  %v498_v18 = vsub.f32 %v1877_v62, %v490_v57  ;;  %v509_v33 = vmul.f32 1.442695, %v496_v49 }
 0x27e   : > { %v997_v20 = vrot.slane %v996_v35, 2  ;;  %1435 = vpow2.f32 %v501_v40  ;;  %v497_v1 = vsub.f32 %v1875_v28, %v490_v57  ;;  %v507_v19 = vmul.f32 1.442695, %v495_v50 }
 0x27f   : > { %1437 = vpow2.f32 %v499_v11  ;;  %v739_v10 = vsub.f32 %v1847_v51, %v737_v5  ;;  %v738_v7 = vsub.f32 %v1845_v48, %v737_v5  ;;  %v513_v21 = vmul.f32 1.442695, %v498_v18 }
 0x280   : > { %v998_v41 = vmax.f32 %v996_v35, %v997_v20  ;;  %1439 = vpow2.f32 %v505_v12  ;;  %v741_v24 = vsub.f32 %v1826_v30, %v737_v5  ;;  %v511_v25 = vmul.f32 1.442695, %v497_v1 }
 0x281   : > { %1441 = vpow2.f32 %v503_v14  ;;  %v740_v62 = vsub.f32 %v1821_v26, %v737_v5  ;;  %v748_v0 = vmul.f32 1.442695, %v739_v10  ;;  %v743_v28 = vsub.f32 %v1907_v15, %v737_v5 }
 0x282   : > { %v999_v27 = vrot.slane %v998_v41, 1  ;;  %1443 = vpow2.f32 %v509_v33  ;;  %v746_v6 = vmul.f32 1.442695, %v738_v7  ;;  %v742_v51 = vsub.f32 %v1905_v13, %v737_v5 }
 0x283   : > { %1445 = vpow2.f32 %v507_v19  ;;  %v752_v48 = vmul.f32 1.442695, %v741_v24  ;;  %v745_v38 = vsub.f32 %v1885_v4, %v737_v5  ;;  %v750_v30 = vmul.f32 1.442695, %v740_v62 }
 0x284   : > { %v1948_v32 = vmax.f32 %v998_v41, %v999_v27  ;;  %1447 = vpow2.f32 %v513_v21  ;;  %v744_v39 = vsub.f32 %v1883_v3, %v737_v5  ;;  %v756_v26 = vmul.f32 1.442695, %v743_v28 }
 0x285   : > { %1449 = vpow2.f32 %v511_v25  ;;  %v754_v15 = vmul.f32 1.442695, %v742_v51  ;;  %v760_v9 = vmul.f32 1.442695, %v745_v38 }
 0x286   : > { %1451 = vpow2.f32 %v748_v0  ;;  %v1002_v42 = vsub.f32 %v1867_v60, %v1948_v32  ;;  %v1001_v13 = vsub.f32 %v1865_v59, %v1948_v32  ;;  %v1004_v4 = vsub.f32 %v1859_v22, %v1948_v32 }
 0x287   : > { %1453 = vpow2.f32 %v746_v6  ;;  %v758_v45 = vmul.f32 1.442695, %v744_v39  ;;  %v1003_v60 = vsub.f32 %v1857_v56, %v1948_v32  ;;  %v1005_v46 = vsub.f32 %v1918_v2, %v1948_v32 }
 0x288   : > { %v1956_v8 = vpop.eup %1435  ;;  %1455 = vpow2.f32 %v752_v48  ;;  %v1011_v53 = vmul.f32 1.442695, %v1002_v42  ;;  %v1009_v54 = vmul.f32 1.442695, %v1001_v13  ;;  %v1015_v55 = vmul.f32 1.442695, %v1004_v4 }
 0x289   : > { %v1960_v44 = vpop.eup %1437  ;;  %v518_v3 = vsel %vm442_vm1, %v1956_v8, 0.0  ;;  %1457 = vpow2.f32 %v750_v30  ;;  %v1006_v57 = vsub.f32 %v1920_v31, %v1948_v32  ;;  %v1013_v63 = vmul.f32 1.442695, %v1003_v60 }
 0x28a   : > { %v1966_v17 = vpop.eup %1439  ;;  %519 = vadd.xlane.f32.xlu1 %v518_v3  ;;  %v515_v59 = vsel %vm442_vm1, %v1960_v44, 0.0  ;;  %1459 = vpow2.f32 %v756_v26  ;;  %v1017_v16 = vmul.f32 1.442695, %v1005_v46  ;;  %v1007_v31 = vsub.f32 %v1926_v36, %v1948_v32 }
 0x28b   : > { %v1970_v43 = vpop.eup %1441  ;;  %516 = vadd.xlane.f32.xlu0 %v515_v59  ;;  %v555_v22 = vadd.f32 %v518_v3, %v515_v59  ;;  %1461 = vpow2.f32 %v754_v15  ;;  %v524_v23 = vsel %vm442_vm1, %v1966_v17, 0.0  ;;  %v1019_v50 = vmul.f32 1.442695, %v1006_v57 }
 0x28c   : > { %v1974_v47 = vpop.eup %1443  ;;  %v521_v56 = vsel %vm442_vm1, %v1970_v43, 0.0  ;;  %1463 = vpow2.f32 %v760_v9  ;;  %v1008_v5 = vsub.f32 %v1928_v37, %v1948_v32  ;;  %v1021_v33 = vmul.f32 1.442695, %v1007_v31 }
 0x28d   : > { %v1980_v58 = vpop.eup %1445  ;;  %v556_v61 = vadd.f32 %v555_v22, %v521_v56  ;;  %1465 = vpow2.f32 %v758_v45  ;;  %v530_v40 = vsel %vm442_vm1, %v1974_v47, 0.0 }
 0x28e   : > { %v1984_v29 = vpop.eup %1447  ;;  %525 = vadd.xlane.f32.xlu1 %v524_v23  ;;  %1467 = vpow2.f32 %v1011_v53  ;;  %v527_v49 = vsel %vm442_vm1, %v1980_v58, 0.0  ;;  %v1023_v7 = vmul.f32 1.442695, %v1008_v5  ;;  %v1601_v5 = vmov 0.0  }
 0x28f   : > { %v1986_v2 = vpop.eup %1449  ;;  %522 = vadd.xlane.f32.xlu0 %v521_v56  ;;  %v557_v52 = vadd.f32 %v556_v61, %v524_v23  ;;  %1469 = vpow2.f32 %v1009_v54  ;;  %v536_v21 = vsel %vm442_vm1, %v1984_v29, 0.0  ;;  %443 = vst.msk [vmem:[%s2067_s25] sm:$0xff] %vm442_vm1, %v1601_v5  ;;  %444 = vst.msk [vmem:[%s2067_s25 + $0x8] sm:$0xff] %vm442_vm1, %v1601_v5 }
 0x290   : > { %v1990_v34 = vpop.eup %1451  ;;  %1471 = vpow2.f32 %v1015_v55  ;;  %v533_v19 = vsel %vm442_vm1, %v1986_v2, 0.0  ;;  %445 = vst.msk [vmem:[%s2067_s25 + $0x10] sm:$0xff] %vm442_vm1, %v1601_v5 }
 0x291   : > { %v1996_v35 = vpop.eup %1453  ;;  %v558_v11 = vadd.f32 %v557_v52, %v527_v49  ;;  %v765_v12 = vsel %vm442_vm1, %v1990_v34, 0.0  ;;  %1473 = vpow2.f32 %v1013_v63 }
 0x292   : > { %v2002_v36 = vpop.eup %1455  ;;  %531 = vadd.xlane.f32.xlu1 %v530_v40  ;;  %v762_v14 = vsel %vm442_vm1, %v1996_v35, 0.0  ;;  %1475 = vpow2.f32 %v1017_v16 }
 0x293   : > { %v2006_v18 = vpop.eup %1457  ;;  %528 = vadd.xlane.f32.xlu0 %v527_v49  ;;  %v559_v37 = vadd.f32 %v558_v11, %v530_v40  ;;  %v802_v20 = vadd.f32 %v765_v12, %v762_v14  ;;  %1477 = vpow2.f32 %v1019_v50  ;;  %v771_v27 = vsel %vm442_vm1, %v2002_v36, 0.0 }
 0x294   : > { %v2008_v1 = vpop.eup %1459  ;;  %v768_v10 = vsel %vm442_vm1, %v2006_v18, 0.0  ;;  %1479 = vpow2.f32 %v1021_v33 }
 0x295   : > { %v2014_v41 = vpop.eup %1461  ;;  %v560_v24 = vadd.f32 %v559_v37, %v533_v19  ;;  %v803_v25 = vadd.f32 %v802_v20, %v768_v10  ;;  %1481 = vpow2.f32 %v1023_v7  ;;  %v777_v26 = vsel %vm442_vm1, %v2008_v1, 0.0 }
 0x296   : > { %v2018_v62 = vpop.eup %1463  ;;  %537 = vadd.xlane.f32.xlu1 %v536_v21  ;;  %v774_v32 = vsel %vm442_vm1, %v2014_v41, 0.0 }
 0x297   : > { %v2022_v0 = vpop.eup %1465  ;;  %534 = vadd.xlane.f32.xlu0 %v533_v19  ;;  %v561_v28 = vadd.f32 %v560_v24, %v536_v21  ;;  %v804_v6 = vadd.f32 %v803_v25, %v771_v27  ;;  %v783_v53 = vsel %vm442_vm1, %v2018_v62, 0.0 }
 0x298   : > { %v2024_v51 = vpop.eup %1467  ;;  %v780_v4 = vsel %vm442_vm1, %v2022_v0, 0.0 }
 0x299   : > { %v2028_v48 = vpop.eup %1469  ;;  %v805_v38 = vadd.f32 %v804_v6, %v774_v32  ;;  %v1028_v30 = vsel %vm442_vm1, %v2024_v51, 0.0  ;;  %v562_v40 = vrot.slane %v561_v28, 4 }
 0x29a   : > { %v2032_v39 = vpop.eup %1471  ;;  %766 = vadd.xlane.f32.xlu1 %v765_v12  ;;  %v1025_v42 = vsel %vm442_vm1, %v2028_v48, 0.0 }
 0x29b   : > { %v2038_v15 = vpop.eup %1473  ;;  %763 = vadd.xlane.f32.xlu0 %v762_v14  ;;  %v806_v13 = vadd.f32 %v805_v38, %v777_v26  ;;  %v1065_v9 = vadd.f32 %v1028_v30, %v1025_v42  ;;  %v1034_v22 = vsel %vm442_vm1, %v2032_v39, 0.0  ;;  %v563_v11 = vadd.f32 %v562_v40, %v561_v28 }
 0x29c   : > { %v1031_v3 = vsel %vm442_vm1, %v2038_v15, 0.0  ;;  %v2044_v45 = vpop.eup %1475 }
 0x29d   : > { %v807_v60 = vadd.f32 %v806_v13, %v780_v4  ;;  %v1066_v59 = vadd.f32 %v1065_v9, %v1031_v3  ;;  %v2050_v54 = vpop.eup %1477  ;;  %v1037_v55 = vsel %vm442_vm1, %v2044_v45, 0.0  ;;  %v564_v12 = vrot.slane %v563_v11, 2 }
 0x29e   : > { %772 = vadd.xlane.f32.xlu1 %v771_v27  ;;  %v2054_v57 = vpop.eup %1479  ;;  %v1040_v61 = vsel %vm442_vm1, %v2050_v54, 0.0 }
 0x29f   : > { %769 = vadd.xlane.f32.xlu0 %v768_v10  ;;  %v808_v46 = vadd.f32 %v807_v60, %v783_v53  ;;  %v1067_v56 = vadd.f32 %v1066_v59, %v1034_v22  ;;  %v2058_v63 = vpop.eup %1481  ;;  %v1043_v16 = vsel %vm442_vm1, %v2054_v57, 0.0  ;;  %v565_v14 = vadd.f32 %v564_v12, %v563_v11 }
 0x2a0   : > { %v1046_v49 = vsel %vm442_vm1, %v2058_v63, 0.0 }
 0x2a1   : > { %v1068_v23 = vadd.f32 %v1067_v56, %v1037_v55  ;;  %v809_v37 = vrot.slane %v808_v46, 4  ;;  %v566_v20 = vrot.slane %v565_v14, 1 }
 0x2a2   : > { %778 = vadd.xlane.f32.xlu1 %v777_v26 }
 0x2a3   : > { %775 = vadd.xlane.f32.xlu0 %v774_v32  ;;  %v1069_v52 = vadd.f32 %v1068_v23, %v1040_v61  ;;  %v810_v33 = vadd.f32 %v809_v37, %v808_v46  ;;  %v567_v19 = vadd.f32 %v566_v20, %v565_v14 }
 0x2a5   : > { %v1070_v31 = vadd.f32 %v1069_v52, %v1043_v16  ;;  %v811_v7 = vrot.slane %v810_v33, 2  ;;  %1483 = vrcp.f32 %v567_v19 }
 0x2a6   : > { %784 = vadd.xlane.f32.xlu1 %v783_v53 }
 0x2a7   : > { %781 = vadd.xlane.f32.xlu0 %v780_v4  ;;  %v1071_v50 = vadd.f32 %v1070_v31, %v1046_v49  ;;  %v812_v27 = vadd.f32 %v811_v7, %v810_v33 }
 0x2a9   : > { %v1072_v10 = vrot.slane %v1071_v50, 4  ;;  %v813_v28 = vrot.slane %v812_v27, 1 }
 0x2aa   : > { %1029 = vadd.xlane.f32.xlu1 %v1028_v30 }
 0x2ab   : > { %1026 = vadd.xlane.f32.xlu0 %v1025_v42  ;;  %v1073_v25 = vadd.f32 %v1072_v10, %v1071_v50  ;;  %v814_v13 = vadd.f32 %v813_v28, %v812_v27 }
 0x2ad   : > { %v1074_v38 = vrot.slane %v1073_v25, 2 }
 0x2ae   : > { %1035 = vadd.xlane.f32.xlu1 %v1034_v22 }
 0x2af   : > { %1032 = vadd.xlane.f32.xlu0 %v1031_v3  ;;  %v1075_v42 = vadd.f32 %v1074_v38, %v1073_v25  ;;  %v1484_v4 = vpop.eup %1483 }
 0x2b0   : > { %v579_v23 = vmul.f32 %v1484_v4, %v1956_v8  ;;  %v578_v31 = vmul.f32 %v1484_v4, %v1960_v44  ;;  %v583_v12 = vmul.f32 %v1484_v4, %v1974_v47  ;;  %v581_v37 = vmul.f32 %v1484_v4, %v1966_v17 }
 0x2b1   : > { %v1076_v53 = vrot.slane %v1075_v42, 1  ;;  %v580_v20 = vmul.f32 %v1484_v4, %v1970_v43  ;;  %v585_v10 = vmul.f32 %v1484_v4, %v1984_v29  ;;  %v584_v7 = vmul.f32 %v1484_v4, %v1986_v2 }
 0x2b2   : > { %1041 = vadd.xlane.f32.xlu1 %v1040_v61 }
 0x2b3   : > { %1038 = vadd.xlane.f32.xlu0 %v1037_v55  ;;  %v1077_v52 = vadd.f32 %v1076_v53, %v1075_v42 }
 0x2b6   : > { %1047 = vadd.xlane.f32.xlu1 %v1046_v49 }
 0x2b7   : > { %1044 = vadd.xlane.f32.xlu0 %v1043_v16 }
 0x317   : > { %v520_v21 = vpop.xlane.xlu1 %519 }
 0x318   : > { %v517_v24 = vpop.xlane.xlu0 %516  ;;  %1485 = vrcp.f32 %v520_v21 }
 0x319   : > { %1487 = vrcp.f32 %v517_v24 }
 0x31b   : > { %v526_v6 = vpop.xlane.xlu1 %525 }
 0x31c   : > { %v523_v32 = vpop.xlane.xlu0 %522  ;;  %1489 = vrcp.f32 %v526_v6 }
 0x31d   : > { %1491 = vrcp.f32 %v523_v32 }
 0x31f   : > { %v532_v30 = vpop.xlane.xlu1 %531 }
 0x320   : > { %1493 = vrcp.f32 %v532_v30  ;;  %v529_v26 = vpop.xlane.xlu0 %528 }
 0x321   : > { %1495 = vrcp.f32 %v529_v26 }
 0x322   : > { %v1486_v60 = vpop.eup %1485 }
 0x323   : > { %v538_v9 = vpop.xlane.xlu1 %537  ;;  %v1488_v59 = vpop.eup %1487  ;;  %v571_v16 = vmul.f32 %v1486_v60, %v1956_v8  ;;  %v582_v8 = vmul.f32 %v1484_v4, %v1980_v58 }
 0x324   : > { %1497 = vrcp.f32 %v538_v9  ;;  %v535_v3 = vpop.xlane.xlu0 %534  ;;  %v570_v49 = vmul.f32 %v1488_v59, %v1960_v44 }
 0x325   : > { %1499 = vrcp.f32 %v535_v3 }
 0x326   : > { %v1490_v22 = vpop.eup %1489  ;;  %1501 = vrcp.f32 %v814_v13  ;;  %v2093_v24 = vmul.f32 %v578_v31, %v570_v49 }
 0x327   : > { %v767_v46 = vpop.xlane.xlu1 %766  ;;  %v1492_v56 = vpop.eup %1491  ;;  %v573_v5 = vmul.f32 %v1490_v22, %v1966_v17 }
 0x328   : > { %1503 = vrcp.f32 %v767_v46  ;;  %v764_v55 = vpop.xlane.xlu0 %763  ;;  %v572_v40 = vmul.f32 %v1492_v56, %v1970_v43  ;;  %v594_v9 = vsel %vm442_vm1, %v2093_v24, -inf }
 0x329   : > { %1505 = vrcp.f32 %v764_v55  ;;  %v2097_v25 = vmul.f32 %v581_v37, %v573_v5 }
 0x32a   : > { %v1494_v61 = vpop.eup %1493 }
 0x32b   : > { %v1496_v50 = vpop.eup %1495  ;;  %v575_v11 = vmul.f32 %v1494_v61, %v1974_v47  ;;  %v773_v14 = vpop.xlane.xlu1 %772  ;;  %v2091_v47 = vmul.f32 %v579_v23, %v571_v16  ;;  %v597_v60 = vsel %vm442_vm1, %v2097_v25, -inf }
 0x32c   : > { %v574_v33 = vmul.f32 %v1496_v50, %v1980_v58  ;;  %v770_v19 = vpop.xlane.xlu0 %769  ;;  %1507 = vrcp.f32 %v773_v14  ;;  %v2099_v58 = vmul.f32 %v580_v20, %v572_v40 }
 0x32d   : > { %v2087_v44 = vmul.f32 %v583_v12, %v575_v11  ;;  %1509 = vrcp.f32 %v1077_v52 }
 0x32e   : > { %v1498_v21 = vpop.eup %1497  ;;  %v2095_v17 = vmul.f32 %v582_v8, %v574_v33  ;;  %1511 = vrcp.f32 %v770_v19  ;;  %v596_v46 = vsel %vm442_vm1, %v2099_v58, -inf }
 0x32f   : > { %v1500_v43 = vpop.eup %1499  ;;  %v577_v27 = vmul.f32 %v1498_v21, %v1984_v29  ;;  %v779_v6 = vpop.xlane.xlu1 %778  ;;  %v600_v32 = vsel %vm442_vm1, %v2087_v44, -inf  ;;  %v595_v29 = vsel %vm442_vm1, %v2091_v47, -inf }
 0x330   : > { %v598_v38 = vsel %vm442_vm1, %v2095_v17, -inf  ;;  %v576_v28 = vmul.f32 %v1500_v43, %v1986_v2  ;;  %1513 = vrcp.f32 %v779_v6  ;;  %v776_v30 = vpop.xlane.xlu0 %775  ;;  %v1502_v26 = vpop.eup %1501  ;;  %v601_v2 = vmax.f32 %v595_v29, %v600_v32 }
 0x331   : > { %v2107_v42 = vmul.f32 %v585_v10, %v577_v27  ;;  %1515 = vrcp.f32 %v776_v30  ;;  %v599_v59 = vmax.f32 %v594_v9, %v598_v38  ;;  %v826_v5 = vmul.f32 %v1502_v26, %v1990_v34 }
 0x332   : > { %v1504_v13 = vpop.eup %1503  ;;  %v2113_v4 = vmul.f32 %v584_v7, %v576_v28  ;;  %v825_v40 = vmul.f32 %v1502_v26, %v1996_v35  ;;  %v828_v14 = vmul.f32 %v1502_v26, %v2002_v36  ;;  %v827_v37 = vmul.f32 %v1502_v26, %v2006_v18 }
 0x333   : > { %v1506_v3 = vpop.eup %1505  ;;  %v604_v53 = vsel %vm442_vm1, %v2107_v42, -inf  ;;  %v785_v22 = vpop.xlane.xlu1 %784  ;;  %v818_v52 = vmul.f32 %v1504_v13, %v1990_v34  ;;  %v606_v49 = vmax.f32 %v599_v59, %v601_v2  ;;  %v830_v20 = vmul.f32 %v1502_v26, %v2008_v1 }
 0x334   : > { %v605_v56 = vmax.f32 %v597_v60, %v604_v53  ;;  %v602_v55 = vsel %vm442_vm1, %v2113_v4, -inf  ;;  %1517 = vrcp.f32 %v785_v22  ;;  %v782_v23 = vpop.xlane.xlu0 %781  ;;  %v817_v16 = vmul.f32 %v1506_v3, %v1996_v35 }
 0x335   : > { %v603_v61 = vmax.f32 %v596_v46, %v602_v55  ;;  %1519 = vrcp.f32 %v782_v23  ;;  %v829_v10 = vmul.f32 %v1502_v26, %v2014_v41  ;;  %v832_v7 = vmul.f32 %v1502_v26, %v2018_v62 }
 0x336   : > { %v1508_v31 = vpop.eup %1507  ;;  %v2132_v21 = vmul.f32 %v826_v5, %v818_v52  ;;  %v2134_v35 = vmul.f32 %v825_v40, %v817_v16  ;;  %v831_v27 = vmul.f32 %v1502_v26, %v2022_v0 }
 0x337   : > { %v607_v50 = vmax.f32 %v603_v61, %v605_v56  ;;  %v1030_v11 = vpop.xlane.xlu1 %1029  ;;  %v1510_v12 = vpop.eup %1509  ;;  %v820_v43 = vmul.f32 %v1508_v31, %v2002_v36 }
 0x338   : > { %1521 = vrcp.f32 %v1030_v11  ;;  %v1027_v8 = vpop.xlane.xlu0 %1026  ;;  %v1512_v33 = vpop.eup %1511  ;;  %v1089_v28 = vmul.f32 %v1510_v12, %v2024_v51  ;;  %v1088_v30 = vmul.f32 %v1510_v12, %v2028_v48  ;;  %v2144_v3 = vmul.f32 %v1510_v12, %v2032_v39 }
 0x339   : > { %v608_v19 = vmax.f32 %v606_v49, %v607_v50  ;;  %1523 = vrcp.f32 %v1027_v8  ;;  %v819_v29 = vmul.f32 %v1512_v33, %v2006_v18  ;;  %v2147_v36 = vmul.f32 %v1510_v12, %v2038_v15 }
 0x33a   : > { %v1514_v34 = vpop.eup %1513  ;;  %v2155_v59 = vmul.f32 %v1510_v12, %v2044_v45  ;;  %v842_v18 = vsel %vm442_vm1, %v2132_v21, -inf  ;;  %v2161_v22 = vmul.f32 %v828_v14, %v820_v43 }
 0x33b   : > { %v1516_v6 = vpop.eup %1515  ;;  %v609_v32 = vrot.slane %v608_v19, 4  ;;  %v822_v38 = vmul.f32 %v1514_v34, %v2008_v1  ;;  %v1036_v13 = vpop.xlane.xlu1 %1035  ;;  %v2152_v1 = vmul.f32 %v1510_v12, %v2050_v54  ;;  %v2168_v16 = vmul.f32 %v827_v37, %v819_v29 }
 0x33c   : > { %v821_v9 = vmul.f32 %v1516_v6, %v2014_v41  ;;  %v1033_v26 = vpop.xlane.xlu0 %1032  ;;  %v841_v41 = vsel %vm442_vm1, %v2134_v35, -inf  ;;  %1525 = vrcp.f32 %v1036_v13  ;;  %v2181_v37 = vmul.f32 %v1510_v12, %v2054_v57 }
 0x33d   : > { %v610_v60 = vmax.f32 %v608_v19, %v609_v32  ;;  %v2149_v2 = vmul.f32 %v830_v20, %v822_v38  ;;  %1527 = vrcp.f32 %v1033_v26  ;;  %v844_v34 = vsel %vm442_vm1, %v2161_v22, -inf }
 0x33e   : > { %v1518_v53 = vpop.eup %1517  ;;  %v2163_v46 = vmul.f32 %v829_v10, %v821_v9  ;;  %v843_v32 = vsel %vm442_vm1, %v2168_v16, -inf }
 0x33f   : > { %v1520_v56 = vpop.eup %1519  ;;  %v611_v55 = vrot.slane %v610_v60, 2  ;;  %v847_v23 = vsel %vm442_vm1, %v2149_v2, -inf  ;;  %v824_v61 = vmul.f32 %v1518_v53, %v2018_v62  ;;  %v1042_v52 = vpop.xlane.xlu1 %1041  ;;  %v2178_v62 = vmul.f32 %v1510_v12, %v2058_v63 }
 0x340   : > { %v845_v31 = vsel %vm442_vm1, %v2163_v46, -inf  ;;  %v823_v49 = vmul.f32 %v1520_v56, %v2022_v0  ;;  %v1039_v50 = vpop.xlane.xlu0 %1038  ;;  %v848_v40 = vmax.f32 %v842_v18, %v847_v23  ;;  %1529 = vrcp.f32 %v1042_v52 }
 0x341   : > { %v612_v5 = vmax.f32 %v610_v60, %v611_v55  ;;  %v846_v11 = vmax.f32 %v841_v41, %v845_v31  ;;  %v2173_v14 = vmul.f32 %v832_v7, %v824_v61  ;;  %1531 = vrcp.f32 %v1039_v50 }
 0x342   : > { %v1522_v20 = vpop.eup %1521  ;;  %v2175_v8 = vmul.f32 %v831_v27, %v823_v49 }
 0x343   : > { %v1524_v33 = vpop.eup %1523  ;;  %v613_v19 = vrot.slane %v612_v5, 1  ;;  %v851_v0 = vsel %vm442_vm1, %v2173_v14, -inf  ;;  %v1081_v10 = vmul.f32 %v1522_v20, %v2024_v51  ;;  %v1048_v7 = vpop.xlane.xlu1 %1047  ;;  %v853_v38 = vmax.f32 %v846_v11, %v848_v40 }
 0x344   : > { %v849_v43 = vsel %vm442_vm1, %v2175_v8, -inf  ;;  %v1080_v27 = vmul.f32 %v1524_v33, %v2028_v48  ;;  %1533 = vrcp.f32 %v1048_v7  ;;  %v1045_v12 = vpop.xlane.xlu0 %1044  ;;  %v852_v51 = vmax.f32 %v844_v34, %v851_v0 }
 0x345   : > { %v614_v6 = vmax.f32 %v612_v5, %v613_v19  ;;  %1535 = vrcp.f32 %v1045_v12  ;;  %v850_v13 = vmax.f32 %v843_v32, %v849_v43  ;;  %v2193_v29 = vmul.f32 %v1089_v28, %v1081_v10 }
 0x346   : > { %v2195_v9 = vmul.f32 %v1088_v30, %v1080_v27  ;;  %v1526_v48 = vpop.eup %1525 }
 0x347   : > { %616 = vst.msk [vmem:[%s2067_s25] sm:$0x1] %vm615_vm2, %v614_v6  ;;  %vm617_vm3 = vcmp.ge.f32.partialorder %v2093_v24, %v614_v6  ;;  %vm618_vm4 = vcmp.ge.f32.partialorder %v2091_v47, %v614_v6  ;;  %vm619_vm5 = vcmp.ge.f32.partialorder %v2099_v58, %v614_v6  ;;  %vm620_vm6 = vcmp.ge.f32.partialorder %v2097_v25, %v614_v6  ;;  %v1528_v53 = vpop.eup %1527 }
 0x348   : > { %vm621_vm7 = vcmp.ge.f32.partialorder %v2095_v17, %v614_v6  ;;  %vm622_vm8 = vcmp.ge.f32.partialorder %v2087_v44, %v614_v6  ;;  %vm623_vm9 = vcmp.ge.f32.partialorder %v2113_v4, %v614_v6  ;;  %vm624_vm10 = vcmp.ge.f32.partialorder %v2107_v42, %v614_v6 }
 0x349   : > { %v2208_v28 = vsel %vm617_vm3, 0.0, %v2093_v24  ;;  %v2211_v30 = vsel %vm618_vm4, 0.0, %v2091_v47  ;;  %v2214_v26 = vsel %vm619_vm5, 0.0, %v2099_v58  ;;  %v2217_v60 = vsel %vm620_vm6, 0.0, %v2097_v25 }
 0x34a   : > { %v2220_v18 = vsel %vm621_vm7, 0.0, %v2095_v17  ;;  %v2223_v41 = vsel %vm622_vm8, 0.0, %v2087_v44  ;;  %v2226_v56 = vsel %vm623_vm9, 0.0, %v2113_v4  ;;  %v2229_v24 = vsel %vm624_vm10, 0.0, %v2107_v42  ;;  %v1530_v44 = vpop.eup %1529 }
 0x34b   : > { %v633_v47 = vsel %vm442_vm1, %v2208_v28, -inf  ;;  %v634_v25 = vsel %vm442_vm1, %v2211_v30, -inf  ;;  %v635_v58 = vsel %vm442_vm1, %v2214_v26, -inf  ;;  %v636_v17 = vsel %vm442_vm1, %v2217_v60, -inf  ;;  %v1532_v61 = vpop.eup %1531 }
 0x34c   : > { %v637_v4 = vsel %vm442_vm1, %v2220_v18, -inf  ;;  %v639_v42 = vsel %vm442_vm1, %v2223_v41, -inf  ;;  %v641_v55 = vsel %vm442_vm1, %v2226_v56, -inf  ;;  %v643_v23 = vsel %vm442_vm1, %v2229_v24, -inf }
 0x34d   : > { %v638_v52 = vmax.f32 %v633_v47, %v637_v4  ;;  %v640_v31 = vmax.f32 %v634_v25, %v639_v42  ;;  %v642_v49 = vmax.f32 %v635_v58, %v641_v55  ;;  %v644_v50 = vmax.f32 %v636_v17, %v643_v23 }
 0x34e   : > { %v1534_v5 = vpop.eup %1533  ;;  %v854_v40 = vmax.f32 %v850_v13, %v852_v51  ;;  %v1105_v11 = vsel %vm442_vm1, %v2193_v29, -inf  ;;  %v1104_v20 = vsel %vm442_vm1, %v2195_v9, -inf  ;;  %v1083_v33 = vmul.f32 %v1526_v48, %v2032_v39 }
 0x34f   : > { %v1536_v19 = vpop.eup %1535  ;;  %v645_v0 = vmax.f32 %v638_v52, %v640_v31  ;;  %v646_v10 = vmax.f32 %v642_v49, %v644_v50  ;;  %v1082_v7 = vmul.f32 %v1528_v53, %v2038_v15  ;;  %v1085_v34 = vmul.f32 %v1530_v44, %v2050_v54 }
 0x350   : > { %v855_v43 = vmax.f32 %v853_v38, %v854_v40  ;;  %v2255_v27 = vmul.f32 %v2144_v3, %v1083_v33  ;;  %v1084_v12 = vmul.f32 %v1532_v61, %v2044_v45  ;;  %v1087_v6 = vmul.f32 %v1534_v5, %v2058_v63 }
 0x351   : > { %v647_v32 = vmax.f32 %v645_v0, %v646_v10  ;;  %v2260_v51 = vmul.f32 %v2147_v36, %v1082_v7  ;;  %v2263_v39 = vmul.f32 %v2152_v1, %v1085_v34  ;;  %v1086_v13 = vmul.f32 %v1536_v19, %v2054_v57 }
 0x352   : > { %v856_v15 = vrot.slane %v855_v43, 4  ;;  %v1107_v54 = vsel %vm442_vm1, %v2255_v27, -inf  ;;  %v2269_v3 = vmul.f32 %v2155_v59, %v1084_v12  ;;  %v2272_v45 = vmul.f32 %v2178_v62, %v1087_v6 }
 0x353   : > { %v648_v63 = vrot.slane %v647_v32, 4  ;;  %v1106_v36 = vsel %vm442_vm1, %v2260_v51, -inf  ;;  %v1110_v1 = vsel %vm442_vm1, %v2263_v39, -inf  ;;  %v2279_v38 = vmul.f32 %v2181_v37, %v1086_v13 }
 0x354   : > { %v857_v57 = vmax.f32 %v855_v43, %v856_v15  ;;  %v1111_v48 = vmax.f32 %v1105_v11, %v1110_v1  ;;  %v1108_v53 = vsel %vm442_vm1, %v2269_v3, -inf  ;;  %v1114_v59 = vsel %vm442_vm1, %v2272_v45, -inf }
 0x355   : > { %v649_v62 = vmax.f32 %v647_v32, %v648_v63  ;;  %v1109_v47 = vmax.f32 %v1104_v20, %v1108_v53  ;;  %v1115_v25 = vmax.f32 %v1107_v54, %v1114_v59  ;;  %v1112_v58 = vsel %vm442_vm1, %v2279_v38, -inf }
 0x356   : > { %v858_v17 = vrot.slane %v857_v57, 2  ;;  %v1113_v44 = vmax.f32 %v1106_v36, %v1112_v58 }
 0x357   : > { %v650_v4 = vrot.slane %v649_v62, 2  ;;  %v1116_v42 = vmax.f32 %v1109_v47, %v1111_v48 }
 0x358   : > { %v859_v37 = vmax.f32 %v857_v57, %v858_v17  ;;  %v1117_v55 = vmax.f32 %v1113_v44, %v1115_v25 }
 0x359   : > { %v651_v23 = vmax.f32 %v649_v62, %v650_v4 }
 0x35a   : > { %v860_v61 = vrot.slane %v859_v37, 1  ;;  %v2287_v52 = vmax.f32 %v1116_v42, %v1117_v55 }
 0x35b   : > { %v652_v31 = vrot.slane %v651_v23, 1 }
 0x35c   : > { %v861_v49 = vmax.f32 %v859_v37, %v860_v61  ;;  %v1119_v5 = vrot.slane %v2287_v52, 4 }
 0x35d   : > { %v653_v50 = vmax.f32 %v651_v23, %v652_v31 }
 0x35e   : > { %1293 = vst.msk [vmem:[%s2067_s25 + $0x8] sm:$0x1] %vm615_vm2, %v861_v49  ;;  %vm864_vm11 = vcmp.ge.f32.partialorder %v2134_v35, %v861_v49  ;;  %vm865_vm12 = vcmp.ge.f32.partialorder %v2132_v21, %v861_v49  ;;  %vm866_vm13 = vcmp.ge.f32.partialorder %v2168_v16, %v861_v49  ;;  %vm867_vm14 = vcmp.ge.f32.partialorder %v2161_v22, %v861_v49 }
 0x35f   : > { %654 = vst.msk [vmem:[%s2067_s25 + $0x1] sm:$0x1] %vm615_vm2, %v653_v50  ;;  %vm655_vm15 = vcmp.ge.f32.partialorder %v2208_v28, %v653_v50  ;;  %vm656_vm0 = vcmp.ge.f32.partialorder %v2211_v30, %v653_v50  ;;  %vm657_vm3 = vcmp.ge.f32.partialorder %v2214_v26, %v653_v50  ;;  %vm658_vm4 = vcmp.ge.f32.partialorder %v2217_v60, %v653_v50 }
 0x360   : > { %vm659_vm5 = vcmp.ge.f32.partialorder %v2220_v18, %v653_v50  ;;  %vm660_vm6 = vcmp.ge.f32.partialorder %v2223_v41, %v653_v50  ;;  %vm661_vm7 = vcmp.ge.f32.partialorder %v2226_v56, %v653_v50  ;;  %vm662_vm8 = vcmp.ge.f32.partialorder %v2229_v24, %v653_v50 }
 0x361   : > { %v663_v40 = vsel %vm655_vm15, 0.0, %v2208_v28  ;;  %v664_v11 = vsel %vm656_vm0, 0.0, %v2211_v30  ;;  %v665_v20 = vsel %vm657_vm3, 0.0, %v2214_v26  ;;  %v666_v33 = vsel %vm658_vm4, 0.0, %v2217_v60 }
 0x362   : > { %v667_v19 = vsel %vm659_vm5, 0.0, %v2220_v18  ;;  %v668_v0 = vsel %vm660_vm6, 0.0, %v2223_v41  ;;  %v669_v10 = vsel %vm661_vm7, 0.0, %v2226_v56  ;;  %v670_v7 = vsel %vm662_vm8, 0.0, %v2229_v24 }
 0x363   : > { %v671_v34 = vsel %vm442_vm1, %v663_v40, -inf  ;;  %v672_v43 = vsel %vm442_vm1, %v664_v11, -inf  ;;  %v673_v28 = vsel %vm442_vm1, %v665_v20, -inf  ;;  %v674_v30 = vsel %vm442_vm1, %v666_v33, -inf }
 0x364   : > { %v675_v26 = vsel %vm442_vm1, %v667_v19, -inf  ;;  %v677_v60 = vsel %vm442_vm1, %v668_v0, -inf  ;;  %v679_v18 = vsel %vm442_vm1, %v669_v10, -inf  ;;  %v681_v41 = vsel %vm442_vm1, %v670_v7, -inf }
 0x365   : > { %v676_v12 = vmax.f32 %v671_v34, %v675_v26  ;;  %v678_v56 = vmax.f32 %v672_v43, %v677_v60  ;;  %v680_v6 = vmax.f32 %v673_v28, %v679_v18  ;;  %v682_v24 = vmax.f32 %v674_v30, %v681_v41 }
 0x366   : > { %vm868_vm9 = vcmp.ge.f32.partialorder %v2163_v46, %v861_v49  ;;  %vm869_vm10 = vcmp.ge.f32.partialorder %v2149_v2, %v861_v49  ;;  %vm870_vm15 = vcmp.ge.f32.partialorder %v2175_v8, %v861_v49  ;;  %vm871_vm0 = vcmp.ge.f32.partialorder %v2173_v14, %v861_v49 }
 0x367   : > { %v683_v32 = vmax.f32 %v676_v12, %v678_v56  ;;  %v684_v13 = vmax.f32 %v680_v6, %v682_v24  ;;  %v2329_v15 = vsel %vm864_vm11, 0.0, %v2134_v35  ;;  %v2334_v54 = vsel %vm865_vm12, 0.0, %v2132_v21 }
 0x368   : > { %v2339_v63 = vsel %vm866_vm13, 0.0, %v2168_v16  ;;  %v2344_v36 = vsel %vm867_vm14, 0.0, %v2161_v22  ;;  %v2347_v1 = vsel %vm868_vm9, 0.0, %v2163_v46  ;;  %v2350_v35 = vsel %vm869_vm10, 0.0, %v2149_v2 }
 0x369   : > { %v685_v57 = vmax.f32 %v683_v32, %v684_v13  ;;  %v2353_v21 = vsel %vm870_vm15, 0.0, %v2175_v8  ;;  %v2356_v48 = vsel %vm871_vm0, 0.0, %v2173_v14  ;;  %v880_v16 = vsel %vm442_vm1, %v2329_v15, -inf }
 0x36a   : > { %v881_v22 = vsel %vm442_vm1, %v2334_v54, -inf  ;;  %v882_v46 = vsel %vm442_vm1, %v2339_v63, -inf  ;;  %v883_v2 = vsel %vm442_vm1, %v2344_v36, -inf  ;;  %v884_v53 = vsel %vm442_vm1, %v2347_v1, -inf }
 0x36b   : > { %v686_v8 = vrot.slane %v685_v57, 4  ;;  %v885_v59 = vmax.f32 %v880_v16, %v884_v53  ;;  %v886_v14 = vsel %vm442_vm1, %v2350_v35, -inf  ;;  %v888_v62 = vsel %vm442_vm1, %v2353_v21, -inf }
 0x36c   : > { %v887_v47 = vmax.f32 %v881_v22, %v886_v14  ;;  %v889_v25 = vmax.f32 %v882_v46, %v888_v62  ;;  %v890_v58 = vsel %vm442_vm1, %v2356_v48, -inf  ;;  %v1120_v17 = vmax.f32 %v2287_v52, %v1119_v5 }
 0x36d   : > { %v687_v44 = vmax.f32 %v685_v57, %v686_v8  ;;  %v891_v4 = vmax.f32 %v883_v2, %v890_v58 }
 0x36e   : > { %v892_v37 = vmax.f32 %v885_v59, %v887_v47  ;;  %v1121_v42 = vrot.slane %v1120_v17, 2 }
 0x36f   : > { %v688_v55 = vrot.slane %v687_v44, 2  ;;  %v893_v23 = vmax.f32 %v889_v25, %v891_v4 }
 0x370   : > { %v1122_v61 = vmax.f32 %v1120_v17, %v1121_v42 }
 0x371   : > { %v689_v31 = vmax.f32 %v687_v44, %v688_v55  ;;  %v894_v49 = vmax.f32 %v892_v37, %v893_v23 }
 0x372   : > { %v1123_v50 = vrot.slane %v1122_v61, 1 }
 0x373   : > { %v690_v40 = vrot.slane %v689_v31, 1  ;;  %v895_v11 = vrot.slane %v894_v49, 4 }
 0x374   : > { %v1124_v20 = vmax.f32 %v1122_v61, %v1123_v50 }
 0x375   : > { %v691_v33 = vmax.f32 %v689_v31, %v690_v40  ;;  %v896_v19 = vmax.f32 %v894_v49, %v895_v11 }
 0x376   : > { %1296 = vst.msk [vmem:[%s2067_s25 + $0x10] sm:$0x1] %vm615_vm2, %v1124_v20  ;;  %vm1127_vm11 = vcmp.ge.f32.partialorder %v2195_v9, %v1124_v20  ;;  %vm1128_vm12 = vcmp.ge.f32.partialorder %v2193_v29, %v1124_v20  ;;  %vm1129_vm13 = vcmp.ge.f32.partialorder %v2260_v51, %v1124_v20  ;;  %vm1130_vm14 = vcmp.ge.f32.partialorder %v2255_v27, %v1124_v20 }
 0x377   : > { %692 = vst.msk [vmem:[%s2067_s25 + $0x2] sm:$0x1] %vm615_vm2, %v691_v33  ;;  %v897_v52 = vrot.slane %v896_v19, 2  ;;  %vm1131_vm3 = vcmp.ge.f32.partialorder %v2269_v3, %v1124_v20  ;;  %vm1132_vm4 = vcmp.ge.f32.partialorder %v2263_v39, %v1124_v20  ;;  %vm1133_vm5 = vcmp.ge.f32.partialorder %v2279_v38, %v1124_v20 }
 0x378   : > { %vm1134_vm6 = vcmp.ge.f32.partialorder %v2272_v45, %v1124_v20  ;;  %v2388_v5 = vsel %vm1127_vm11, 0.0, %v2195_v9  ;;  %v2391_v0 = vsel %vm1128_vm12, 0.0, %v2193_v29  ;;  %v2394_v10 = vsel %vm1129_vm13, 0.0, %v2260_v51 }
 0x379   : > { %v898_v7 = vmax.f32 %v896_v19, %v897_v52  ;;  %v2397_v34 = vsel %vm1130_vm14, 0.0, %v2255_v27  ;;  %v2400_v43 = vsel %vm1131_vm3, 0.0, %v2269_v3  ;;  %v2403_v28 = vsel %vm1132_vm4, 0.0, %v2263_v39 }
 0x37a   : > { %v2406_v30 = vsel %vm1133_vm5, 0.0, %v2279_v38  ;;  %v2409_v29 = vsel %vm1134_vm6, 0.0, %v2272_v45  ;;  %v1143_v9 = vsel %vm442_vm1, %v2388_v5, -inf  ;;  %v1144_v27 = vsel %vm442_vm1, %v2391_v0, -inf }
 0x37b   : > { %v899_v51 = vrot.slane %v898_v7, 1  ;;  %v1145_v3 = vsel %vm442_vm1, %v2394_v10, -inf  ;;  %v1146_v39 = vsel %vm442_vm1, %v2397_v34, -inf  ;;  %v1147_v38 = vsel %vm442_vm1, %v2400_v43, -inf }
 0x37c   : > { %v1149_v45 = vsel %vm442_vm1, %v2403_v28, -inf  ;;  %v1151_v26 = vsel %vm442_vm1, %v2406_v30, -inf  ;;  %v1153_v60 = vsel %vm442_vm1, %v2409_v29, -inf  ;;  %v1148_v41 = vmax.f32 %v1143_v9, %v1147_v38 }
 0x37d   : > { %v900_v18 = vmax.f32 %v898_v7, %v899_v51  ;;  %v1150_v12 = vmax.f32 %v1144_v27, %v1149_v45  ;;  %v1152_v56 = vmax.f32 %v1145_v3, %v1151_v26  ;;  %v1154_v6 = vmax.f32 %v1146_v39, %v1153_v60 }
 0x37f   : > { %1294 = vst.msk [vmem:[%s2067_s25 + $0x9] sm:$0x1] %vm615_vm2, %v900_v18  ;;  %vm902_vm7 = vcmp.ge.f32.partialorder %v2329_v15, %v900_v18  ;;  %vm903_vm8 = vcmp.ge.f32.partialorder %v2334_v54, %v900_v18  ;;  %vm904_vm9 = vcmp.ge.f32.partialorder %v2339_v63, %v900_v18  ;;  %vm905_vm10 = vcmp.ge.f32.partialorder %v2344_v36, %v900_v18 }
 0x380   : > { %vm906_vm15 = vcmp.ge.f32.partialorder %v2347_v1, %v900_v18  ;;  %vm907_vm0 = vcmp.ge.f32.partialorder %v2350_v35, %v900_v18  ;;  %vm908_vm11 = vcmp.ge.f32.partialorder %v2353_v21, %v900_v18  ;;  %vm909_vm12 = vcmp.ge.f32.partialorder %v2356_v48, %v900_v18 }
 0x381   : > { %v910_v24 = vsel %vm902_vm7, 0.0, %v2329_v15  ;;  %v911_v32 = vsel %vm903_vm8, 0.0, %v2334_v54  ;;  %v912_v13 = vsel %vm904_vm9, 0.0, %v2339_v63  ;;  %v913_v57 = vsel %vm905_vm10, 0.0, %v2344_v36 }
 0x382   : > { %v914_v16 = vsel %vm906_vm15, 0.0, %v2347_v1  ;;  %v915_v22 = vsel %vm907_vm0, 0.0, %v2350_v35  ;;  %v916_v46 = vsel %vm908_vm11, 0.0, %v2353_v21  ;;  %v917_v2 = vsel %vm909_vm12, 0.0, %v2356_v48 }
 0x383   : > { %v918_v53 = vsel %vm442_vm1, %v910_v24, -inf  ;;  %v919_v8 = vsel %vm442_vm1, %v911_v32, -inf  ;;  %v920_v15 = vsel %vm442_vm1, %v912_v13, -inf  ;;  %v921_v54 = vsel %vm442_vm1, %v913_v57, -inf }
 0x384   : > { %v922_v63 = vsel %vm442_vm1, %v914_v16, -inf  ;;  %v924_v36 = vsel %vm442_vm1, %v915_v22, -inf  ;;  %v926_v1 = vsel %vm442_vm1, %v916_v46, -inf  ;;  %v928_v35 = vsel %vm442_vm1, %v917_v2, -inf }
 0x385   : > { %v923_v59 = vmax.f32 %v918_v53, %v922_v63  ;;  %v925_v21 = vmax.f32 %v919_v8, %v924_v36  ;;  %v927_v14 = vmax.f32 %v920_v15, %v926_v1  ;;  %v929_v48 = vmax.f32 %v921_v54, %v928_v35 }
 0x386   : > { %v1155_v62 = vmax.f32 %v1148_v41, %v1150_v12  ;;  %v1156_v47 = vmax.f32 %v1152_v56, %v1154_v6 }
 0x387   : > { %v930_v25 = vmax.f32 %v923_v59, %v925_v21  ;;  %v931_v58 = vmax.f32 %v927_v14, %v929_v48 }
 0x388   : > { %v1157_v17 = vmax.f32 %v1155_v62, %v1156_v47 }
 0x389   : > { %v932_v44 = vmax.f32 %v930_v25, %v931_v58 }
 0x38a   : > { %v1158_v4 = vrot.slane %v1157_v17, 4 }
 0x38b   : > { %v933_v37 = vrot.slane %v932_v44, 4 }
 0x38c   : > { %v1159_v42 = vmax.f32 %v1157_v17, %v1158_v4 }
 0x38d   : > { %v934_v55 = vmax.f32 %v932_v44, %v933_v37 }
 0x38e   : > { %v1160_v23 = vrot.slane %v1159_v42, 2 }
 0x38f   : > { %v935_v61 = vrot.slane %v934_v55, 2 }
 0x390   : > { %v1161_v31 = vmax.f32 %v1159_v42, %v1160_v23 }
 0x391   : > { %v936_v49 = vmax.f32 %v934_v55, %v935_v61 }
 0x392   : > { %v1162_v50 = vrot.slane %v1161_v31, 1 }
 0x393   : > { %v937_v40 = vrot.slane %v936_v49, 1 }
 0x394   : > { %v1163_v11 = vmax.f32 %v1161_v31, %v1162_v50 }
 0x395   : > { %v938_v20 = vmax.f32 %v936_v49, %v937_v40 }
 0x396   : > { %1297 = vst.msk [vmem:[%s2067_s25 + $0x11] sm:$0x1] %vm615_vm2, %v1163_v11  ;;  %vm1165_vm13 = vcmp.ge.f32.partialorder %v2388_v5, %v1163_v11  ;;  %vm1166_vm14 = vcmp.ge.f32.partialorder %v2391_v0, %v1163_v11  ;;  %vm1167_vm3 = vcmp.ge.f32.partialorder %v2394_v10, %v1163_v11  ;;  %vm1168_vm4 = vcmp.ge.f32.partialorder %v2397_v34, %v1163_v11 }
 0x397   : > { %1295 = vst.msk [vmem:[%s2067_s25 + $0xa] sm:$0x1] %vm615_vm2, %v938_v20  ;;  %vm1169_vm5 = vcmp.ge.f32.partialorder %v2400_v43, %v1163_v11  ;;  %vm1170_vm6 = vcmp.ge.f32.partialorder %v2403_v28, %v1163_v11  ;;  %vm1171_vm7 = vcmp.ge.f32.partialorder %v2406_v30, %v1163_v11  ;;  %vm1172_vm8 = vcmp.ge.f32.partialorder %v2409_v29, %v1163_v11 }
 0x398   : > { %v1173_v33 = vsel %vm1165_vm13, 0.0, %v2388_v5  ;;  %v1174_v19 = vsel %vm1166_vm14, 0.0, %v2391_v0  ;;  %v1175_v52 = vsel %vm1167_vm3, 0.0, %v2394_v10  ;;  %v1176_v7 = vsel %vm1168_vm4, 0.0, %v2397_v34 }
 0x399   : > { %v1177_v9 = vsel %vm1169_vm5, 0.0, %v2400_v43  ;;  %v1178_v27 = vsel %vm1170_vm6, 0.0, %v2403_v28  ;;  %v1179_v51 = vsel %vm1171_vm7, 0.0, %v2406_v30  ;;  %v1180_v3 = vsel %vm1172_vm8, 0.0, %v2409_v29 }
 0x39a   : > { %v1181_v39 = vsel %vm442_vm1, %v1173_v33, -inf  ;;  %v1182_v38 = vsel %vm442_vm1, %v1174_v19, -inf  ;;  %v1183_v5 = vsel %vm442_vm1, %v1175_v52, -inf  ;;  %v1184_v0 = vsel %vm442_vm1, %v1176_v7, -inf }
 0x39b   : > { %v1185_v10 = vsel %vm442_vm1, %v1177_v9, -inf  ;;  %v1187_v34 = vsel %vm442_vm1, %v1178_v27, -inf  ;;  %v1189_v43 = vsel %vm442_vm1, %v1179_v51, -inf  ;;  %v1191_v28 = vsel %vm442_vm1, %v1180_v3, -inf }
 0x39c   : > { %v1186_v30 = vmax.f32 %v1181_v39, %v1185_v10  ;;  %v1188_v29 = vmax.f32 %v1182_v38, %v1187_v34  ;;  %v1190_v45 = vmax.f32 %v1183_v5, %v1189_v43  ;;  %v1192_v26 = vmax.f32 %v1184_v0, %v1191_v28 }
 0x39e   : > { %v1193_v60 = vmax.f32 %v1186_v30, %v1188_v29  ;;  %v1194_v18 = vmax.f32 %v1190_v45, %v1192_v26 }
 0x3a0   : > { %v1195_v41 = vmax.f32 %v1193_v60, %v1194_v18 }
 0x3a2   : > { %v1196_v12 = vrot.slane %v1195_v41, 4 }
 0x3a4   : > { %v1197_v56 = vmax.f32 %v1195_v41, %v1196_v12 }
 0x3a6   : > { %v1198_v6 = vrot.slane %v1197_v56, 2 }
 0x3a8   : > { %v1199_v24 = vmax.f32 %v1197_v56, %v1198_v6 }
 0x3aa   : > { %v1200_v32 = vrot.slane %v1199_v24, 1 }
 0x3ac   : > { %v1201_v13 = vmax.f32 %v1199_v24, %v1200_v32 }
 0x3ae   : > { %1298 = vst.msk [vmem:[%s2067_s25 + $0x12] sm:$0x1] %vm615_vm2, %v1201_v13 }
 0x3af   : > { %1550 = shalt.err (!%p1547_p3)
}
 0x3b0   : > { %s1551_s7 = scalar_lea.hbm %s2486_s30, 384  ;;  %s1555_s16 = scalar_lea.hbm %s2537_s2, 768 }
 0x3b1   : > { %p1552_p4 = scmp.ne.s32.totalorder %s2486_s30, %s1551_s7  ;;  %p1556_p9 = scmp.lt.u32.totalorder %s2486_s30, %s2537_s2 }
 0x3b2   : > { %p1557_p10 = scmp.lt.u32.totalorder %s1555_s16, %s1551_s7  ;;  %p1559_p12 = scmp.lt.u32.totalorder %s1551_s7, %s2486_s30 }
 0x3b3   : > { %p1553_p7 = pnand %p1552_p4, %p1658_p5 }
 0x3b4   : > { %p1558_p11 = por %p1557_p10, %p1556_p9 }
 0x3b5   : > { %p1554_p8 = pneg %p1553_p7 }
 0x3b6   : > { %p1560_p13 = por %p1559_p12, %p1558_p11 }
 0x3b8   : > { %p1561_p0 = pnand %p1560_p13, %p1554_p8 }
 0x3ba   : > { %1564 = shalt.err (!%p1561_p0)
}
 0x3bb   : > { %s1603_s22 = smov 128   ;;  %s1604_s23 = smov 8  }
 0x3bc   : > { %1361 = dma.vmem_to_hbm [thread:$0]  (%p1658_p5), %s2488_s27, 384, %s2486_s30, %s2494_s3, %s1603_s22, %s1603_s22, %s1604_s23  }
 0x3bd PF: > { %p1367_p1 = scmp.ge.s32.totalorder %s1599_s12, 2  ;;  %s1232_s24 = sand.u32 1, %s1587_s9  }
 0x3be   : > { %s1233_s25 = scalar_lea.sflag [#allocation3], %s1232_s24 }
 0x3bf   : > { %p1364_p2 = pnand %p1367_p1, %p1662_p6 }
 0x3c1   : > { %1582 = dma.done.wait (!%p1364_p2), %s1233_s25, 384  }
 0x3c2   : > { %1584 = vsyncadd (!%p1364_p2), %s1233_s25, 4294966912  ;;  %p12_p3 = scmp.ge.s32.totalorder %s1645_s15, 4   ;;  %s2540_s9 = smov %s1591_s10 }
 0x3c3   : > { %s2541_s10 = smov %s1595_s11  ;;  %s2542_s11 = smov %s1656_s18 }
 0x3c4   : > { %s2543_s12 = smov %s1645_s15  ;;  %14 = sbr.rel (!%p12_p3) target bundleno = 3 (0x3), region = 65 }
 0x3cb   :  { %1238 = vsyncpa [#allocation3], 1 }
 0x3cc   :  { %1240 = vsyncpa [#allocation3 + $0x1], 1 }

</bundles_post_ra>
